<compile_context>
chip_gen: v5e
topology: v5e:2x2
jax: 0.10.0
libtpu: 0.0.40
codegen_flags: <defaults>
</compile_context>

<pallas_src>
import jax
import jax.numpy as jnp
from jax import lax
from jax.experimental import pallas as pl
from jax.experimental.pallas import tpu as pltpu

EPS = 1e-3


def bn_relu_kernel(x_ref, gamma_ref, beta_ref, o_ref):
    # x_ref: [N, C, HW]   (C on the sublane axis, HW on the lane axis)
    # gamma_ref, beta_ref: [1, C, 1]
    x = x_ref[...].astype(jnp.float32)
    n, c, hw = x.shape
    inv_count = 1.0 / (n * hw)

    # One-pass per-channel statistics (single read of x).
    s = jnp.sum(x, axis=2, keepdims=True)           # [N, C, 1]  lane reduce
    sq = jnp.sum(x * x, axis=2, keepdims=True)      # [N, C, 1]
    s = jnp.sum(s, axis=0, keepdims=True)           # [1, C, 1]  (trivial, N=1)
    sq = jnp.sum(sq, axis=0, keepdims=True)         # [1, C, 1]

    mean = s * inv_count
    var = sq * inv_count - mean * mean              # biased variance
    inv_std = lax.rsqrt(var + EPS)

    # Fold the BN affine into a single per-channel scale/shift.
    a = gamma_ref[...] * inv_std                    # [1, C, 1]
    b = beta_ref[...] - mean * a                    # [1, C, 1]

    o_ref[...] = jnp.maximum(x * a + b, 0.0).astype(o_ref.dtype)


def batchnorm_relu(x_nchw, gamma, beta):
    """x_nchw: [N, C, H, W] float32; gamma, beta: [C] float32."""
    n, c, h, w = x_nchw.shape
    hw = h * w

    # Zero-copy views: no NCHW<->NHWC transposes around the kernel.
    x3 = x_nchw.reshape(n, c, hw)
    gamma3 = gamma.reshape(1, c, 1)
    beta3 = beta.reshape(1, c, 1)

    out3 = pl.pallas_call(
        bn_relu_kernel,
        out_shape=jax.ShapeDtypeStruct((n, c, hw), x_nchw.dtype),
        grid_spec=pltpu.PrefetchScalarGridSpec(
            num_scalar_prefetch=0,
            grid=(1,),
            in_specs=[
                pl.BlockSpec((n, c, hw), lambda i: (0, 0, 0)),
                pl.BlockSpec((1, c, 1), lambda i: (0, 0, 0)),
                pl.BlockSpec((1, c, 1), lambda i: (0, 0, 0)),
            ],
            out_specs=pl.BlockSpec((n, c, hw), lambda i: (0, 0, 0)),
        ),
        compiler_params=pltpu.CompilerParams(
            dimension_semantics=("arbitrary",)),
    )(x3, gamma3, beta3)

    # Zero-copy view back to NCHW.
    return out3.reshape(n, c, h, w)


def reference(x_nchw, gamma, beta):
    mean = jnp.mean(x_nchw, axis=(0, 2, 3), keepdims=True)
    var = jnp.mean((x_nchw - mean) ** 2, axis=(0, 2, 3), keepdims=True)
    y = (x_nchw - mean) / jnp.sqrt(var + EPS)
    y = y * gamma.reshape(1, -1, 1, 1) + beta.reshape(1, -1, 1, 1)
    return jnp.maximum(y, 0.0)


if __name__ == "__main__":
    key = jax.random.PRNGKey(0)
    kx, kg, kb = jax.random.split(key, 3)

    # Shapes from the module: BatchNorm2d(192) on [1, 192, 12, 12].
    x = jax.random.normal(kx, (1, 192, 12, 12), dtype=jnp.float32)
    gamma = 1.0 + 0.1 * jax.random.normal(kg, (192,), dtype=jnp.float32)
    beta = 0.1 * jax.random.normal(kb, (192,), dtype=jnp.float32)

    out = batchnorm_relu(x, gamma, beta)
    jax.block_until_ready(out)

    ref = reference(x, gamma, beta)
    assert out.shape == (1, 192, 12, 12)
    assert jnp.max(jnp.abs(out - ref)) < 2e-4

    print("KERNEL_OK")
</pallas_src>

<mosaic_0001>
module attributes {stable_mosaic.version = 11 : i64} {
  func.func @bn_relu_kernel(%arg0: i32, %arg1: memref<1x192x144xf32, #tpu.memory_space<vmem>>, %arg2: memref<1x192x1xf32, #tpu.memory_space<vmem>>, %arg3: memref<1x192x1xf32, #tpu.memory_space<vmem>>, %arg4: memref<1x192x144xf32, #tpu.memory_space<vmem>>) attributes {dimension_semantics = [#tpu.dimension_semantics<arbitrary>], iteration_bounds = array<i64: 1>, scalar_prefetch = 0 : i64, scratch_operands = 0 : i64, tpu.core_type = #tpu.core_type<tc>, window_params = [{pipeline_mode = #tpu.pipeline_mode<synchronous>, transform_indices = @transform_0, window_bounds = array<i64: 1, 192, 144>}, {pipeline_mode = #tpu.pipeline_mode<synchronous>, transform_indices = @transform_1, window_bounds = array<i64: 1, 192, 1>}, {pipeline_mode = #tpu.pipeline_mode<synchronous>, transform_indices = @transform_2, window_bounds = array<i64: 1, 192, 1>}, {pipeline_mode = #tpu.pipeline_mode<synchronous>, transform_indices = @transform_3, window_bounds = array<i64: 1, 192, 144>}]} {
    %c0 = arith.constant 0 : index
    %c0_0 = arith.constant 0 : index
    %c0_1 = arith.constant 0 : index
    %0 = vector.load %arg1[%c0, %c0_0, %c0_1] : memref<1x192x144xf32, #tpu.memory_space<vmem>>, vector<1x192x144xf32>
    %cst = arith.constant dense<0.000000e+00> : vector<1x192xf32>
    %1 = vector.multi_reduction <add>, %0, %cst [2] : vector<1x192x144xf32> to vector<1x192xf32>
    %2 = vector.shape_cast %1 : vector<1x192xf32> to vector<1x192x1xf32>
    %3 = arith.mulf %0, %0 : vector<1x192x144xf32>
    %cst_2 = arith.constant dense<0.000000e+00> : vector<1x192xf32>
    %4 = vector.multi_reduction <add>, %3, %cst_2 [2] : vector<1x192x144xf32> to vector<1x192xf32>
    %5 = vector.shape_cast %4 : vector<1x192xf32> to vector<1x192x1xf32>
    %cst_3 = arith.constant dense<0.000000e+00> : vector<192x1xf32>
    %6 = vector.multi_reduction <add>, %2, %cst_3 [0] : vector<1x192x1xf32> to vector<192x1xf32>
    %7 = vector.shape_cast %6 : vector<192x1xf32> to vector<1x192x1xf32>
    %cst_4 = arith.constant dense<0.000000e+00> : vector<192x1xf32>
    %8 = vector.multi_reduction <add>, %5, %cst_4 [0] : vector<1x192x1xf32> to vector<192x1xf32>
    %9 = vector.shape_cast %8 : vector<192x1xf32> to vector<1x192x1xf32>
    %cst_5 = arith.constant 0.0069444445 : f32
    %10 = vector.broadcast %cst_5 : f32 to vector<1x192x1xf32>
    %11 = arith.mulf %7, %10 : vector<1x192x1xf32>
    %cst_6 = arith.constant 0.0069444445 : f32
    %12 = vector.broadcast %cst_6 : f32 to vector<1x192x1xf32>
    %13 = arith.mulf %9, %12 : vector<1x192x1xf32>
    %14 = arith.mulf %11, %11 : vector<1x192x1xf32>
    %15 = arith.subf %13, %14 : vector<1x192x1xf32>
    %cst_7 = arith.constant 1.000000e-03 : f32
    %16 = vector.broadcast %cst_7 : f32 to vector<1x192x1xf32>
    %17 = arith.addf %15, %16 : vector<1x192x1xf32>
    %18 = math.rsqrt %17 : vector<1x192x1xf32>
    %c0_8 = arith.constant 0 : index
    %c0_9 = arith.constant 0 : index
    %c0_10 = arith.constant 0 : index
    %19 = vector.load %arg2[%c0_8, %c0_9, %c0_10] : memref<1x192x1xf32, #tpu.memory_space<vmem>>, vector<1x192x1xf32>
    %20 = arith.mulf %19, %18 : vector<1x192x1xf32>
    %c0_11 = arith.constant 0 : index
    %c0_12 = arith.constant 0 : index
    %c0_13 = arith.constant 0 : index
    %21 = vector.load %arg3[%c0_11, %c0_12, %c0_13] : memref<1x192x1xf32, #tpu.memory_space<vmem>>, vector<1x192x1xf32>
    %22 = arith.mulf %11, %20 : vector<1x192x1xf32>
    %23 = arith.subf %21, %22 : vector<1x192x1xf32>
    %24 = vector.broadcast %20 : vector<1x192x1xf32> to vector<1x192x144xf32>
    %25 = arith.mulf %0, %24 : vector<1x192x144xf32>
    %26 = vector.broadcast %23 : vector<1x192x1xf32> to vector<1x192x144xf32>
    %27 = arith.addf %25, %26 : vector<1x192x144xf32>
    %cst_14 = arith.constant 0.000000e+00 : f32
    %28 = vector.broadcast %cst_14 : f32 to vector<1x192x144xf32>
    %29 = arith.maximumf %27, %28 : vector<1x192x144xf32>
    %c0_15 = arith.constant 0 : index
    %c0_16 = arith.constant 0 : index
    %c0_17 = arith.constant 0 : index
    %30 = vector.load %arg4[%c0_15, %c0_16, %c0_17] : memref<1x192x144xf32, #tpu.memory_space<vmem>>, vector<1x192x144xf32>
    tpu.vector_store %arg4[%c0_15, %c0_16, %c0_17], %29 {strides = array<i32>} : memref<1x192x144xf32, #tpu.memory_space<vmem>>, vector<1x192x144xf32>,
    return
  }
  func.func @transform_0(%arg0: i32) -> (i32, i32, i32) {
    %c0_i32 = arith.constant 0 : i32
    %c0_i32_0 = arith.constant 0 : i32
    %c0_i32_1 = arith.constant 0 : i32
    %c0_i32_2 = arith.constant 0 : i32
    return %c0_i32, %c0_i32_0, %c0_i32_1 : i32, i32, i32
  }
  func.func @transform_1(%arg0: i32) -> (i32, i32, i32) {
    %c0_i32 = arith.constant 0 : i32
    %c0_i32_0 = arith.constant 0 : i32
    %c0_i32_1 = arith.constant 0 : i32
    %c0_i32_2 = arith.constant 0 : i32
    return %c0_i32, %c0_i32_0, %c0_i32_1 : i32, i32, i32
  }
  func.func @transform_2(%arg0: i32) -> (i32, i32, i32) {
    %c0_i32 = arith.constant 0 : i32
    %c0_i32_0 = arith.constant 0 : i32
    %c0_i32_1 = arith.constant 0 : i32
    %c0_i32_2 = arith.constant 0 : i32
    return %c0_i32, %c0_i32_0, %c0_i32_1 : i32, i32, i32
  }
  func.func @transform_3(%arg0: i32) -> (i32, i32, i32) {
    %c0_i32 = arith.constant 0 : i32
    %c0_i32_0 = arith.constant 0 : i32
    %c0_i32_1 = arith.constant 0 : i32
    %c0_i32_2 = arith.constant 0 : i32
    return %c0_i32, %c0_i32_0, %c0_i32_1 : i32, i32, i32
  }
}

</mosaic_0001>

<bundles_post_ra>
// kernel: tpu_custom_call.1
= control target key start
LH: loop header
LB: loop body
LE: loop exit
PB: predicated region body
PF: predicated region fallthrough
CT: control target
= control target key end

     0   :  { %vm62_vm0 = vcmask 130048   ;;  %s3063_s0 = inlined_call_operand.vmem [shape: f32[1,192,144], index: 0, kind: input, shape index: {}]   ;;  %s3064_s1 = inlined_call_operand.vmem [shape: f32[1,192,1], index: 1, kind: input, shape index: {}]   ;;  %s3065_s2 = inlined_call_operand.vmem [shape: f32[1,192,1], index: 2, kind: input, shape index: {}]   ;;  %s3066_s3 = inlined_call_operand.vmem [shape: f32[1,192,144], index: 3, kind: output, shape index: {}]  }
   0x1   :  { %v1391_v0 = vld [vmem:[%s3063_s0 + $0x40] sm:$0xff]  ;;  %v1396_v1 = vld [vmem:[%s3063_s0 + $0x48] sm:$0xff]  ;;  %v1428_v10 = vld [vmem:[%s3063_s0 + $0x58] sm:$0xff] }
   0x2   :  { %v1401_v2 = vld [vmem:[%s3063_s0 + $0x20] sm:$0xff]  ;;  %v79_v3 = vsel %vm62_vm0, %v1396_v1, 0.0  ;;  %v1408_v4 = vld [vmem:[%s3063_s0 + $0x28] sm:$0xff]  ;;  %v1435_v13 = vld [vmem:[%s3063_s0 + $0x38] sm:$0xff]  ;;  %v83_v16 = vsel %vm62_vm0, %v1428_v10, 0.0 }
   0x3   :  { %v1413_v5 = vld [vmem:[%s3063_s0] sm:$0xff]  ;;  %v1418_v6 = vld [vmem:[%s3063_s0 + $0x8] sm:$0xff]  ;;  %v80_v7 = vadd.f32 %v79_v3, %v1391_v0  ;;  %v71_v8 = vsel %vm62_vm0, %v1408_v4, 0.0  ;;  %v1440_v14 = vld [vmem:[%s3063_s0 + $0x18] sm:$0xff]  ;;  %v75_v18 = vsel %vm62_vm0, %v1435_v13, 0.0 }
   0x4   :  { %v63_v9 = vsel %vm62_vm0, %v1418_v6, 0.0  ;;  %v72_v11 = vadd.f32 %v71_v8, %v1401_v2  ;;  %v1445_v15 = vld [vmem:[%s3063_s0 + $0x50] sm:$0xff]  ;;  %v67_v20 = vsel %vm62_vm0, %v1440_v14, 0.0  ;;  %v1469_v24 = vld [vmem:[%s3063_s0 + $0x88] sm:$0xff]  ;;  %v1474_v25 = vld [vmem:[%s3063_s0 + $0x78] sm:$0xff] }
   0x5   :  { %v64_v12 = vadd.f32 %v63_v9, %v1413_v5  ;;  %81 = vadd.xlane.f32.xlu2 %v80_v7  ;;  %v1452_v17 = vld [vmem:[%s3063_s0 + $0x30] sm:$0xff]  ;;  %v84_v21 = vadd.f32 %v83_v16, %v1445_v15  ;;  %v1479_v26 = vld [vmem:[%s3063_s0 + $0x68] sm:$0xff]  ;;  %v1484_v27 = vld [vmem:[%s3063_s0 + $0x80] sm:$0xff]  ;;  %v95_v28 = vsel %vm62_vm0, %v1469_v24, 0.0  ;;  %v91_v30 = vsel %vm62_vm0, %v1474_v25, 0.0 }
   0x6   :  { %73 = vadd.xlane.f32.xlu1 %v72_v11  ;;  %v1459_v19 = vld [vmem:[%s3063_s0 + $0x10] sm:$0xff]  ;;  %v76_v22 = vadd.f32 %v75_v18, %v1452_v17  ;;  %v1498_v31 = vld [vmem:[%s3063_s0 + $0x60] sm:$0xff]  ;;  %v87_v32 = vsel %vm62_vm0, %v1479_v26, 0.0  ;;  %v96_v33 = vadd.f32 %v95_v28, %v1484_v27  ;;  %v1508_v36 = vld [vmem:[%s3063_s0 + $0xb8] sm:$0xff] }
   0x7   :  { %65 = vadd.xlane.f32.xlu0 %v64_v12  ;;  %v68_v23 = vadd.f32 %v67_v20, %v1459_v19  ;;  %v1491_v29 = vld [vmem:[%s3063_s0 + $0x70] sm:$0xff]  ;;  %v88_v35 = vadd.f32 %v87_v32, %v1498_v31  ;;  %v1513_v37 = vld [vmem:[%s3063_s0 + $0xa8] sm:$0xff]  ;;  %v1518_v38 = vld [vmem:[%s3063_s0 + $0x98] sm:$0xff]  ;;  %v107_v40 = vsel %vm62_vm0, %v1508_v36, 0.0 }
   0x8   :  { %v92_v34 = vadd.f32 %v91_v30, %v1491_v29  ;;  %v1523_v39 = vld [vmem:[%s3063_s0 + $0xb0] sm:$0xff]  ;;  %v1530_v41 = vld [vmem:[%s3063_s0 + $0xa0] sm:$0xff]  ;;  %v103_v42 = vsel %vm62_vm0, %v1513_v37, 0.0  ;;  %v99_v44 = vsel %vm62_vm0, %v1518_v38, 0.0  ;;  %v1547_v48 = vld [vmem:[%s3063_s0 + $0xe8] sm:$0xff] }
   0x9   :  { %v1537_v43 = vld [vmem:[%s3063_s0 + $0x90] sm:$0xff]  ;;  %v108_v45 = vadd.f32 %v107_v40, %v1523_v39  ;;  %v104_v46 = vadd.f32 %v103_v42, %v1530_v41  ;;  %v1552_v49 = vld [vmem:[%s3063_s0 + $0xd8] sm:$0xff]  ;;  %v1557_v50 = vld [vmem:[%s3063_s0 + $0xc8] sm:$0xff]  ;;  %v119_v52 = vsel %vm62_vm0, %v1547_v48, 0.0 }
   0xa   :  { %v100_v47 = vadd.f32 %v99_v44, %v1537_v43  ;;  %v1562_v51 = vld [vmem:[%s3063_s0 + $0xe0] sm:$0xff]  ;;  %v1569_v53 = vld [vmem:[%s3063_s0 + $0xd0] sm:$0xff]  ;;  %v115_v54 = vsel %vm62_vm0, %v1552_v49, 0.0  ;;  %v111_v56 = vsel %vm62_vm0, %v1557_v50, 0.0  ;;  %v1586_v60 = vld [vmem:[%s3063_s0 + $0x118] sm:$0xff] }
   0xb   :  { %v1576_v55 = vld [vmem:[%s3063_s0 + $0xc0] sm:$0xff]  ;;  %v120_v57 = vadd.f32 %v119_v52, %v1562_v51  ;;  %v116_v58 = vadd.f32 %v115_v54, %v1569_v53  ;;  %v1591_v61 = vld [vmem:[%s3063_s0 + $0x108] sm:$0xff]  ;;  %v1596_v62 = vld [vmem:[%s3063_s0 + $0xf8] sm:$0xff]  ;;  %v131_v3 = vsel %vm62_vm0, %v1586_v60, 0.0 }
   0xc   :  { %v112_v59 = vadd.f32 %v111_v56, %v1576_v55  ;;  %v1601_v63 = vld [vmem:[%s3063_s0 + $0x110] sm:$0xff]  ;;  %v1608_v7 = vld [vmem:[%s3063_s0 + $0x100] sm:$0xff]  ;;  %v127_v8 = vsel %vm62_vm0, %v1591_v61, 0.0  ;;  %v123_v11 = vsel %vm62_vm0, %v1596_v62, 0.0  ;;  %v1625_v20 = vld [vmem:[%s3063_s0 + $0x148] sm:$0xff] }
   0xd   :  { %85 = vadd.xlane.f32.xlu2 %v84_v21  ;;  %v1615_v9 = vld [vmem:[%s3063_s0 + $0xf0] sm:$0xff]  ;;  %v132_v12 = vadd.f32 %v131_v3, %v1601_v63  ;;  %v128_v16 = vadd.f32 %v127_v8, %v1608_v7  ;;  %v1630_v21 = vld [vmem:[%s3063_s0 + $0x138] sm:$0xff]  ;;  %v143_v28 = vsel %vm62_vm0, %v1625_v20, 0.0  ;;  %v1686_v54 = vld [vmem:[%s3063_s0 + $0x160] sm:$0xff] }
   0xe   :  { %77 = vadd.xlane.f32.xlu1 %v76_v22  ;;  %v124_v18 = vadd.f32 %v123_v11, %v1615_v9  ;;  %v1635_v22 = vld [vmem:[%s3063_s0 + $0x128] sm:$0xff]  ;;  %v1647_v30 = vld [vmem:[%s3063_s0 + $0x130] sm:$0xff]  ;;  %v139_v32 = vsel %vm62_vm0, %v1630_v21, 0.0  ;;  %v1664_v44 = vld [vmem:[%s3063_s0 + $0x178] sm:$0xff]  ;;  %v164_v11 = vmul.f32 %v1408_v4, %v1408_v4  ;;  %v159_v4 = vmul.f32 %v1413_v5, %v1413_v5 }
   0xf   :  { %69 = vadd.xlane.f32.xlu0 %v68_v23  ;;  %v1640_v23 = vld [vmem:[%s3063_s0 + $0x140] sm:$0xff]  ;;  %v140_v40 = vadd.f32 %v139_v32, %v1647_v30  ;;  %v155_v52 = vsel %vm62_vm0, %v1664_v44, 0.0  ;;  %v161_v32 = vmul.f32 %v1459_v19, %v1459_v19  ;;  %v169_v5 = vmul.f32 %v1445_v15, %v1445_v15 }
  0x10   :  { %v176_v15 = vmul.f32 %v1469_v24, %v1469_v24  ;;  %v171_v24 = vmul.f32 %v1498_v31, %v1498_v31 }
  0x15   :  { %97 = vadd.xlane.f32.xlu2 %v96_v33  ;;  %v1654_v33 = vld [vmem:[%s3063_s0 + $0x120] sm:$0xff] }
  0x16   :  { %93 = vadd.xlane.f32.xlu1 %v92_v34  ;;  %v135_v34 = vsel %vm62_vm0, %v1635_v22, 0.0 }
  0x17   :  { %89 = vadd.xlane.f32.xlu0 %v88_v35  ;;  %v144_v35 = vadd.f32 %v143_v28, %v1640_v23  ;;  %v136_v42 = vadd.f32 %v135_v34, %v1654_v33  ;;  %v215_v28 = vsel %vm62_vm0, %v164_v11, 0.0  ;;  %v172_v11 = vmul.f32 %v1479_v26, %v1479_v26 }
  0x1d   :  { %109 = vadd.xlane.f32.xlu2 %v108_v45  ;;  %v1669_v45 = vld [vmem:[%s3063_s0 + $0x168] sm:$0xff] }
  0x1e   :  { %105 = vadd.xlane.f32.xlu1 %v104_v46  ;;  %v1674_v46 = vld [vmem:[%s3063_s0 + $0x158] sm:$0xff]  ;;  %v151_v56 = vsel %vm62_vm0, %v1669_v45, 0.0 }
  0x1f   :  { %101 = vadd.xlane.f32.xlu0 %v100_v47  ;;  %v1679_v47 = vld [vmem:[%s3063_s0 + $0x170] sm:$0xff]  ;;  %v152_v3 = vadd.f32 %v151_v56, %v1686_v54  ;;  %v167_v56 = vmul.f32 %v1391_v0, %v1391_v0  ;;  %v175_v0 = vmul.f32 %v1484_v27, %v1484_v27  ;;  %v182_v27 = vmul.f32 %v1508_v36, %v1508_v36 }
  0x20   :  { %v177_v36 = vmul.f32 %v1537_v43, %v1537_v43 }
  0x21   :  { %v251_v31 = vsel %vm62_vm0, %v182_v27, 0.0 }
  0x25   :  { %121 = vadd.xlane.f32.xlu2 %v120_v57  ;;  %v1693_v57 = vld [vmem:[%s3063_s0 + $0x150] sm:$0xff] }
  0x26   :  { %117 = vadd.xlane.f32.xlu1 %v116_v58  ;;  %v147_v58 = vsel %vm62_vm0, %v1674_v46, 0.0 }
  0x27   :  { %113 = vadd.xlane.f32.xlu0 %v112_v59  ;;  %v156_v59 = vadd.f32 %v155_v52, %v1679_v47  ;;  %v148_v8 = vadd.f32 %v147_v58, %v1693_v57  ;;  %v166_v52 = vmul.f32 %v1435_v13, %v1435_v13 }
  0x2d   :  { %133 = vadd.xlane.f32.xlu2 %v132_v12  ;;  %v162_v12 = vmul.f32 %v1440_v14, %v1440_v14 }
  0x2e   :  { %129 = vadd.xlane.f32.xlu1 %v128_v16  ;;  %v160_v16 = vmul.f32 %v1418_v6, %v1418_v6 }
  0x2f   :  { %125 = vadd.xlane.f32.xlu0 %v124_v18  ;;  %v163_v18 = vmul.f32 %v1401_v2, %v1401_v2  ;;  %v211_v34 = vsel %vm62_vm0, %v162_v12, 0.0  ;;  %v170_v2 = vmul.f32 %v1428_v10, %v1428_v10  ;;  %v165_v10 = vmul.f32 %v1452_v17, %v1452_v17 }
  0x30   :  { %v207_v14 = vsel %vm62_vm0, %v160_v16, 0.0  ;;  %v212_v6 = vadd.f32 %v211_v34, %v161_v32  ;;  %v239_v17 = vsel %vm62_vm0, %v176_v15, 0.0  ;;  %v173_v12 = vmul.f32 %v1491_v29, %v1491_v29 }
  0x31   :  { %v227_v19 = vsel %vm62_vm0, %v170_v2, 0.0  ;;  %v180_v32 = vmul.f32 %v1513_v37, %v1513_v37  ;;  %v181_v29 = vmul.f32 %v1523_v39, %v1523_v39  ;;  %v179_v34 = vmul.f32 %v1530_v41, %v1530_v41 }
  0x32   :  { %v188_v39 = vmul.f32 %v1547_v48, %v1547_v48  ;;  %v184_v2 = vmul.f32 %v1557_v50, %v1557_v50  ;;  %v187_v41 = vmul.f32 %v1562_v51, %v1562_v51  ;;  %v183_v48 = vmul.f32 %v1576_v55, %v1576_v55 }
  0x33   :  { %v194_v51 = vmul.f32 %v1586_v60, %v1586_v60  ;;  %v189_v60 = vmul.f32 %v1615_v9, %v1615_v9  ;;  %v196_v15 = vmul.f32 %v1635_v22, %v1635_v22 }
  0x34   :  { %v263_v43 = vsel %vm62_vm0, %v188_v39, 0.0 }
  0x35   :  { %145 = vadd.xlane.f32.xlu2 %v144_v35  ;;  %v216_v35 = vadd.f32 %v215_v28, %v163_v18  ;;  %v240_v18 = vadd.f32 %v239_v17, %v175_v0  ;;  %v275_v55 = vsel %vm62_vm0, %v194_v51, 0.0 }
  0x36   :  { %141 = vadd.xlane.f32.xlu1 %v140_v40  ;;  %v208_v40 = vadd.f32 %v207_v14, %v159_v4  ;;  %v178_v4 = vmul.f32 %v1518_v38, %v1518_v38  ;;  %v247_v14 = vsel %vm62_vm0, %v180_v32, 0.0 }
  0x37   :  { %137 = vadd.xlane.f32.xlu0 %v136_v42  ;;  %v168_v42 = vmul.f32 %v1396_v1, %v1396_v1  ;;  %v219_v1 = vsel %vm62_vm0, %v166_v52, 0.0  ;;  %v248_v38 = vadd.f32 %v247_v14, %v179_v34 }
  0x38   :  { %v243_v37 = vsel %vm62_vm0, %v178_v4, 0.0 }
  0x39   :  { %v223_v58 = vsel %vm62_vm0, %v168_v42, 0.0  ;;  %v185_v42 = vmul.f32 %v1569_v53, %v1569_v53  ;;  %v193_v53 = vmul.f32 %v1601_v63, %v1601_v63  ;;  %v200_v63 = vmul.f32 %v1625_v20, %v1625_v20 }
  0x3a   :  { %v224_v13 = vadd.f32 %v223_v58, %v167_v56  ;;  %v192_v56 = vmul.f32 %v1591_v61, %v1591_v61  ;;  %v191_v58 = vmul.f32 %v1608_v7, %v1608_v7  ;;  %v199_v7 = vmul.f32 %v1640_v23, %v1640_v23 }
  0x3b   :  { %v287_v9 = vsel %vm62_vm0, %v200_v63, 0.0  ;;  %v195_v20 = vmul.f32 %v1654_v33, %v1654_v33  ;;  %v206_v23 = vmul.f32 %v1664_v44, %v1664_v44  ;;  %v201_v44 = vmul.f32 %v1693_v57, %v1693_v57 }
  0x3c   :  { %v288_v0 = vadd.f32 %v287_v9, %v199_v7 }
  0x3d   :  { %157 = vadd.xlane.f32.xlu2 %v156_v59  ;;  %v228_v59 = vadd.f32 %v227_v19, %v169_v5  ;;  %v264_v5 = vadd.f32 %v263_v43, %v187_v41  ;;  %v299_v33 = vsel %vm62_vm0, %v206_v23, 0.0 }
  0x3e   :  { %153 = vadd.xlane.f32.xlu1 %v152_v3  ;;  %v220_v3 = vadd.f32 %v219_v1, %v165_v10  ;;  %v190_v10 = vmul.f32 %v1596_v62, %v1596_v62  ;;  %v271_v1 = vsel %vm62_vm0, %v192_v56, 0.0 }
  0x3f   :  { %149 = vadd.xlane.f32.xlu0 %v148_v8  ;;  %v174_v8 = vmul.f32 %v1474_v25, %v1474_v25  ;;  %v231_v25 = vsel %vm62_vm0, %v172_v11, 0.0  ;;  %v272_v62 = vadd.f32 %v271_v1, %v191_v58 }
  0x40   :  { %v232_v28 = vadd.f32 %v231_v25, %v171_v24  ;;  %v267_v61 = vsel %vm62_vm0, %v190_v10, 0.0  ;;  %v202_v24 = vmul.f32 %v1674_v46, %v1674_v46 }
  0x41   :  { %v235_v16 = vsel %vm62_vm0, %v174_v8, 0.0  ;;  %v197_v8 = vmul.f32 %v1647_v30, %v1647_v30  ;;  %v205_v30 = vmul.f32 %v1679_v47, %v1679_v47 }
  0x42   :  { %v236_v26 = vadd.f32 %v235_v16, %v173_v12  ;;  %v204_v12 = vmul.f32 %v1669_v45, %v1669_v45  ;;  %v203_v16 = vmul.f32 %v1686_v54, %v1686_v54  ;;  %v291_v45 = vsel %vm62_vm0, %v202_v24, 0.0 }
  0x43   :  { %v292_v47 = vadd.f32 %v291_v45, %v201_v44 }
  0x44   :  { %v295_v25 = vsel %vm62_vm0, %v204_v12, 0.0 }
  0x45   :  { %217 = vadd.xlane.f32.xlu2 %v216_v35  ;;  %v252_v35 = vadd.f32 %v251_v31, %v181_v29  ;;  %v296_v27 = vadd.f32 %v295_v25, %v203_v16 }
  0x46   :  { %213 = vadd.xlane.f32.xlu1 %v212_v6  ;;  %v244_v6 = vadd.f32 %v243_v37, %v177_v36 }
  0x47   :  { %209 = vadd.xlane.f32.xlu0 %v208_v40  ;;  %v186_v40 = vmul.f32 %v1552_v49, %v1552_v49  ;;  %v255_v49 = vsel %vm62_vm0, %v184_v2, 0.0 }
  0x48   :  { %v256_v19 = vadd.f32 %v255_v49, %v183_v48  ;;  %v1367_v49 = vmov 0  }
  0x49   :  { %v259_v52 = vsel %vm62_vm0, %v186_v40, 0.0  ;;  %1270 = vset.pattern.permute.xlu2 %v1367_v49  ;;  %1269 = vset.pattern.permute.xlu1 %v1367_v49 }
  0x4a   :  { %v260_v50 = vadd.f32 %v259_v52, %v185_v42  ;;  %1268 = vset.pattern.permute.xlu0 %v1367_v49 }
  0x4d   :  { %229 = vadd.xlane.f32.xlu2 %v228_v59  ;;  %v276_v59 = vadd.f32 %v275_v55, %v193_v53 }
  0x4e   :  { %225 = vadd.xlane.f32.xlu1 %v224_v13  ;;  %v268_v13 = vadd.f32 %v267_v61, %v189_v60 }
  0x4f   :  { %221 = vadd.xlane.f32.xlu0 %v220_v3  ;;  %v198_v3 = vmul.f32 %v1630_v21, %v1630_v21  ;;  %v279_v21 = vsel %vm62_vm0, %v196_v15, 0.0 }
  0x50   :  { %v280_v17 = vadd.f32 %v279_v21, %v195_v20 }
  0x51   :  { %v283_v11 = vsel %vm62_vm0, %v198_v3, 0.0 }
  0x52   :  { %v284_v22 = vadd.f32 %v283_v11, %v197_v8 }
  0x55   :  { %241 = vadd.xlane.f32.xlu2 %v240_v18 }
  0x56   :  { %237 = vadd.xlane.f32.xlu1 %v236_v26 }
  0x57   :  { %233 = vadd.xlane.f32.xlu0 %v232_v28  ;;  %v300_v28 = vadd.f32 %v299_v33, %v205_v30 }
  0x5d   :  { %253 = vadd.xlane.f32.xlu2 %v252_v35 }
  0x5e   :  { %249 = vadd.xlane.f32.xlu1 %v248_v38 }
  0x5f   :  { %245 = vadd.xlane.f32.xlu0 %v244_v6 }
  0x65   :  { %265 = vadd.xlane.f32.xlu2 %v264_v5 }
  0x66   :  { %261 = vadd.xlane.f32.xlu1 %v260_v50 }
  0x67   :  { %257 = vadd.xlane.f32.xlu0 %v256_v19 }
  0x6d   :  { %277 = vadd.xlane.f32.xlu2 %v276_v59 }
  0x6e   :  { %273 = vadd.xlane.f32.xlu1 %v272_v62 }
  0x6f   :  { %269 = vadd.xlane.f32.xlu0 %v268_v13 }
  0x75   :  { %289 = vadd.xlane.f32.xlu2 %v288_v0 }
  0x76   :  { %285 = vadd.xlane.f32.xlu1 %v284_v22 }
  0x77   :  { %281 = vadd.xlane.f32.xlu0 %v280_v17 }
  0x78   :  { %v82_v18 = vpop.xlane.xlu2 %81 }
  0x79   :  { %v74_v46 = vpop.xlane.xlu1 %73  ;;  %v1840_v56 = vmul.f32 0.0069444445, %v82_v18 }
  0x7a   :  { %v66_v26 = vpop.xlane.xlu0 %65  ;;  %v1834_v5 = vmul.f32 0.0069444445, %v74_v46 }
  0x7b   :  { %v1836_v50 = vmul.f32 0.0069444445, %v66_v26  ;;  %v403_v7 = vmul.f32 %v1840_v56, %v1840_v56 }
  0x7c   :  { %v401_v10 = vmul.f32 %v1834_v5, %v1834_v5 }
  0x7d   :  { %301 = vadd.xlane.f32.xlu2 %v300_v28  ;;  %v399_v53 = vmul.f32 %v1836_v50, %v1836_v50 }
  0x7e   :  { %297 = vadd.xlane.f32.xlu1 %v296_v27 }
  0x7f   :  { %293 = vadd.xlane.f32.xlu0 %v292_v47 }
  0x80   :  { %v86_v32 = vpop.xlane.xlu2 %85 }
  0x81   :  { %v78_v4 = vpop.xlane.xlu1 %77  ;;  %v1846_v1 = vmul.f32 0.0069444445, %v86_v32 }
  0x82   :  { %v70_v29 = vpop.xlane.xlu0 %69  ;;  %v1850_v13 = vmul.f32 0.0069444445, %v78_v4 }
  0x83   :  { %v1838_v19 = vmul.f32 0.0069444445, %v70_v29  ;;  %v404_v20 = vmul.f32 %v1846_v1, %v1846_v1 }
  0x84   :  { %v402_v22 = vmul.f32 %v1850_v13, %v1850_v13 }
  0x85   :  { %v400_v61 = vmul.f32 %v1838_v19, %v1838_v19 }
  0x88   :  { %v98_v54 = vpop.xlane.xlu2 %97 }
  0x89   :  { %v94_v31 = vpop.xlane.xlu1 %93  ;;  %v1854_v9 = vmul.f32 0.0069444445, %v98_v54 }
  0x8a   :  { %v90_v34 = vpop.xlane.xlu0 %89  ;;  %v1860_v11 = vmul.f32 0.0069444445, %v94_v31 }
  0x8b   :  { %3083 = vst [vmem:[#allocation2_spill] sm:$0xff] %v1854_v9  ;;  %v1868_v17 = vmul.f32 0.0069444445, %v90_v34  ;;  %v407_v46 = vmul.f32 %v1854_v9, %v1854_v9 }
  0x8c   :  { %v406_v26 = vmul.f32 %v1860_v11, %v1860_v11 }
  0x8d   :  { %v405_v47 = vmul.f32 %v1868_v17, %v1868_v17 }
  0x90   :  { %v110_v57 = vpop.xlane.xlu2 %109 }
  0x91   :  { %v106_v36 = vpop.xlane.xlu1 %105  ;;  %v1870_v23 = vmul.f32 0.0069444445, %v110_v57 }
  0x92   :  { %v102_v14 = vpop.xlane.xlu0 %101  ;;  %v1873_v12 = vmul.f32 0.0069444445, %v106_v36 }
  0x93   :  { %3084 = vst [vmem:[#allocation3_spill] sm:$0xff] %v1870_v23  ;;  %v1875_v24 = vmul.f32 0.0069444445, %v102_v14  ;;  %v1897_v54 = vmul.f32 %v1870_v23, %v1870_v23 }
  0x94   :  { %3085 = vst [vmem:[#allocation4_spill] sm:$0xff] %v1873_v12  ;;  %v1901_v31 = vmul.f32 %v1873_v12, %v1873_v12 }
  0x95   :  { %3086 = vst [vmem:[#allocation5_spill] sm:$0xff] %v1875_v24  ;;  %v1907_v14 = vmul.f32 %v1875_v24, %v1875_v24 }
  0x98   :  { %v122_v37 = vpop.xlane.xlu2 %121 }
  0x99   :  { %v118_v35 = vpop.xlane.xlu1 %117  ;;  %v1877_v30 = vmul.f32 0.0069444445, %v122_v37 }
  0x9a   :  { %v114_v38 = vpop.xlane.xlu0 %113  ;;  %v1880_v16 = vmul.f32 0.0069444445, %v118_v35 }
  0x9b   :  { %3087 = vst [vmem:[#allocation6_spill] sm:$0xff] %v1877_v30  ;;  %v1882_v44 = vmul.f32 0.0069444445, %v114_v38  ;;  %v1911_v37 = vmul.f32 %v1877_v30, %v1877_v30 }
  0x9c   :  { %3088 = vst [vmem:[#allocation7_spill] sm:$0xff] %v1880_v16  ;;  %v1915_v35 = vmul.f32 %v1880_v16, %v1880_v16 }
  0x9d   :  { %3089 = vst [vmem:[#allocation8_spill] sm:$0xff] %v1882_v44  ;;  %v1919_v38 = vmul.f32 %v1882_v44, %v1882_v44 }
  0xa0   :  { %v134_v6 = vpop.xlane.xlu2 %133 }
  0xa1   :  { %v130_v39 = vpop.xlane.xlu1 %129  ;;  %v1891_v32 = vmul.f32 0.0069444445, %v134_v6 }
  0xa2   :  { %v1820_v40 = vpop.xlane.xlu0 %125  ;;  %v1893_v4 = vmul.f32 0.0069444445, %v130_v39 }
  0xa3   :  { %3090 = vst [vmem:[#allocation9_spill] sm:$0xff] %v1891_v32  ;;  %v1924_v39 = vmul.f32 0.0069444445, %v1820_v40 }
  0xa4   :  { %3091 = vst [vmem:[#allocation10_spill] sm:$0xff] %v1893_v4 }
  0xa5   :  { %3092 = vst [vmem:[#allocation11_spill] sm:$0xff] %v1924_v39 }
  0xa8   :  { %v1822_v2 = vpop.xlane.xlu2 %145 }
  0xa9   :  { %v1824_v41 = vpop.xlane.xlu1 %141 }
  0xaa   :  { %v1826_v43 = vpop.xlane.xlu0 %137 }
  0xb0   :  { %v1828_v42 = vpop.xlane.xlu2 %157 }
  0xb1   :  { %v1830_v48 = vpop.xlane.xlu1 %153 }
  0xb2   :  { %v1832_v52 = vpop.xlane.xlu0 %149 }
  0xb8   :  { %v218_v51 = vpop.xlane.xlu2 %217 }
  0xb9   :  { %v377_v55 = vmul.f32 0.0069444445, %v218_v51  ;;  %v214_v58 = vpop.xlane.xlu1 %213 }
  0xba   :  { %v210_v60 = vpop.xlane.xlu0 %209  ;;  %v376_v59 = vmul.f32 0.0069444445, %v214_v58  ;;  %v1940_v58 = vmul.f32 %v1893_v4, %v1893_v4 }
  0xbb   :  { %v375_v62 = vmul.f32 0.0069444445, %v210_v60  ;;  %v425_v63 = vsub.f32 %v377_v55, %v401_v10  ;;  %v1936_v55 = vmul.f32 %v1891_v32, %v1891_v32 }
  0xbc   :  { %v424_v3 = vsub.f32 %v376_v59, %v400_v61  ;;  %v1947_v61 = vmul.f32 0.0069444445, %v1822_v2  ;;  %v1960_v2 = vmul.f32 %v1924_v39, %v1924_v39 }
  0xbd   :  { %v423_v15 = vsub.f32 %v375_v62, %v399_v53  ;;  %v1856_v8 = vadd.f32 0.001, %v425_v63 }
  0xbe   :  { %v1862_v21 = vadd.f32 0.001, %v424_v3  ;;  %3093 = vst [vmem:[#allocation12_spill] sm:$0xff] %v1947_v61  ;;  %v1954_v3 = vmul.f32 0.0069444445, %v1824_v41 }
  0xbf   :  { %v1864_v0 = vadd.f32 0.001, %v423_v15  ;;  %1271 = vrsqrt.f32 %v1856_v8  ;;  %vm497_vm2 = vweird.f32 %v1856_v8 }
  0xc0   :  { %1273 = vrsqrt.f32 %v1862_v21  ;;  %v230_v33 = vpop.xlane.xlu2 %229  ;;  %3094 = vst [vmem:[#allocation13_spill] sm:$0xff] %v1954_v3  ;;  %vm487_vm4 = vweird.f32 %v1862_v21 }
  0xc1   :  { %1275 = vrsqrt.f32 %v1864_v0  ;;  %v380_v25 = vmul.f32 0.0069444445, %v230_v33  ;;  %v226_v45 = vpop.xlane.xlu1 %225  ;;  %vm477_vm8 = vweird.f32 %v1864_v0 }
  0xc2   :  { %v222_v18 = vpop.xlane.xlu0 %221  ;;  %v379_v28 = vmul.f32 0.0069444445, %v226_v45 }
  0xc3   :  { %v378_v27 = vmul.f32 0.0069444445, %v222_v18  ;;  %v428_v29 = vsub.f32 %v380_v25, %v404_v20  ;;  %v1963_v18 = vmul.f32 0.0069444445, %v1826_v43  ;;  %v1976_v43 = vmul.f32 0.0069444445, %v1828_v42 }
  0xc4   :  { %v427_v34 = vsub.f32 %v379_v28, %v403_v7 }
  0xc5   :  { %v426_v57 = vsub.f32 %v378_v27, %v402_v22  ;;  %v1903_v36 = vpop.eup %1271  ;;  %v1944_v60 = vadd.f32 0.001, %v428_v29  ;;  %3095 = vst [vmem:[#allocation14_spill] sm:$0xff] %v1963_v18 }
  0xc6   :  { %v1921_v6 = vpop.eup %1273  ;;  %v492_v49 = vmul.f32 %v1903_v36, %v1856_v8  ;;  %v1928_v51 = vadd.f32 0.001, %v427_v34  ;;  %3096 = vst [vmem:[#allocation15_spill] sm:$0xff] %v1976_v43  ;;  %vm498_vm1 = vweird.f32 %v1903_v36 }
  0xc7   :  { %v1930_v10 = vadd.f32 0.001, %v426_v57  ;;  %v1932_v53 = vpop.eup %1275  ;;  %v482_v40 = vmul.f32 %v1921_v6, %v1862_v21  ;;  %vm488_vm3 = vweird.f32 %v1921_v6  ;;  %vm499_vm5 = vmor %vm497_vm2, %vm498_vm1  ;;  %v2021_v21 = vmul.f32 0.0069444445, %v1832_v52 }
  0xc8   :  { %v493_v59 = vmul.f32 %v1903_v36, %v492_v49  ;;  %v472_v62 = vmul.f32 %v1932_v53, %v1864_v0  ;;  %1277 = vrsqrt.f32 %v1928_v51  ;;  %v242_v63 = vpop.xlane.xlu2 %241  ;;  %v1969_v49 = vmul.f32 %v1947_v61, %v1947_v61  ;;  %vm2029_vm6 = vmor %vm487_vm4, %vm488_vm3 }
  0xc9   :  { %v483_v15 = vmul.f32 %v1921_v6, %v482_v40  ;;  %1279 = vrsqrt.f32 %v1930_v10  ;;  %v383_v7 = vmul.f32 0.0069444445, %v242_v63  ;;  %v238_v20 = vpop.xlane.xlu1 %237  ;;  %v1973_v40 = vmul.f32 %v1954_v3, %v1954_v3  ;;  %3098 = vst [vmem:[#allocation17_spill] sm:$0xff] %v2021_v21 }
  0xca   :  { %v234_v22 = vpop.xlane.xlu0 %233  ;;  %v494_v33 = vmul.f32 0.5, %v493_v59  ;;  %v382_v25 = vmul.f32 0.0069444445, %v238_v20  ;;  %1281 = vrsqrt.f32 %v1944_v60  ;;  %v473_v29 = vmul.f32 %v1932_v53, %v472_v62 }
  0xcb   :  { %v381_v45 = vmul.f32 0.0069444445, %v234_v22  ;;  %v484_v28 = vmul.f32 0.5, %v483_v15  ;;  %v431_v41 = vsub.f32 %v383_v7, %v407_v46  ;;  %v1983_v46 = vmul.f32 0.0069444445, %v1830_v48 }
  0xcc   :  { %v495_v27 = vsub.f32 1.5, %v494_v33  ;;  %v430_v34 = vsub.f32 %v382_v25, %v406_v26  ;;  %v474_v48 = vmul.f32 0.5, %v473_v29  ;;  %vm478_vm7 = vweird.f32 %v1932_v53 }
  0xcd   :  { %v429_v57 = vsub.f32 %v381_v45, %v405_v47  ;;  %v1978_v59 = vadd.f32 0.001, %v431_v41  ;;  %3097 = vst [vmem:[#allocation16_spill] sm:$0xff] %v1983_v46  ;;  %v485_v15 = vsub.f32 1.5, %v484_v28  ;;  %vm517_vm9 = vweird.f32 %v1928_v51  ;;  %vm479_vm10 = vmor %vm477_vm8, %vm478_vm7 }
  0xce   :  { %v1980_v63 = vpop.eup %1277  ;;  %v1985_v26 = vadd.f32 0.001, %v430_v34  ;;  %v496_v7 = vmul.f32 %v1903_v36, %v495_v27  ;;  %v2007_v27 = vmul.f32 %v1963_v18, %v1963_v18  ;;  %v475_v52 = vsub.f32 1.5, %v474_v48 }
  0xcf   :  { %v1987_v47 = vadd.f32 0.001, %v429_v57  ;;  %v1990_v62 = vpop.eup %1279  ;;  %v512_v42 = vmul.f32 %v1980_v63, %v1928_v51  ;;  %1283 = vrsqrt.f32 %v1978_v59  ;;  %v713_v57 = vld [vmem:[%s3064_s1 + $0x10] sm:$0xff]  ;;  %v486_v18 = vmul.f32 %v1921_v6, %v485_v15  ;;  %v715_v51 = vld [vmem:[%s3064_s1 + $0x20] sm:$0xff] }
  0xd0   :  { %1285 = vrsqrt.f32 %v1985_v26  ;;  %v254_v20 = vpop.xlane.xlu2 %253  ;;  %v1999_v22 = vpop.eup %1281  ;;  %v502_v25 = vmul.f32 %v1990_v62, %v1930_v10  ;;  %v500_v61 = vsel %vm499_vm5, %v1903_v36, %v496_v7  ;;  %vm518_vm11 = vweird.f32 %v1980_v63 }
  0xd1   :  { %v513_v33 = vmul.f32 %v1980_v63, %v512_v42  ;;  %1287 = vrsqrt.f32 %v1987_v47  ;;  %v386_v45 = vmul.f32 0.0069444445, %v254_v20  ;;  %v250_v28 = vpop.xlane.xlu1 %249  ;;  %v2039_v7 = vmul.f32 %v713_v57, %v500_v61  ;;  %vm2107_vm12 = vmor %vm517_vm9, %vm518_vm11 }
  0xd2   :  { %v246_v41 = vpop.xlane.xlu0 %245  ;;  %v385_v29 = vmul.f32 0.0069444445, %v250_v28  ;;  %v522_v28 = vmul.f32 %v1999_v22, %v1944_v60  ;;  %v503_v15 = vmul.f32 %v1990_v62, %v502_v25  ;;  %vm507_vm13 = vweird.f32 %v1930_v10 }
  0xd3   :  { %v384_v34 = vmul.f32 0.0069444445, %v246_v41  ;;  %v514_v42 = vmul.f32 0.5, %v513_v33  ;;  %v434_v20 = vsub.f32 %v386_v45, %v1897_v54  ;;  %v712_v54 = vld [vmem:[%s3064_s1 + $0x8] sm:$0xff]  ;;  %v2048_v45 = vmul.f32 %v1976_v43, %v1976_v43  ;;  %843 = vperm.xlu2 %1270, %v2039_v7   ;;  %v711_v33 = vld [vmem:[%s3064_s1] sm:$0xff] }
  0xd4   :  { %v433_v8 = vsub.f32 %v385_v29, %v1901_v31  ;;  %v490_v31 = vsel %vm2029_vm6, %v1921_v6, %v486_v18  ;;  %v523_v18 = vmul.f32 %v1999_v22, %v522_v28  ;;  %vm547_vm14 = vweird.f32 %v1985_v26 }
  0xd5   :  { %v432_v41 = vsub.f32 %v384_v34, %v1907_v14  ;;  %v2036_v36 = vpop.eup %1283  ;;  %v515_v61 = vsub.f32 1.5, %v514_v42  ;;  %v2059_v57 = vadd.f32 0.001, %v434_v20  ;;  %v2062_v6 = vmul.f32 %v712_v54, %v490_v31 }
  0xd6   :  { %v2044_v14 = vpop.eup %1285  ;;  %v2050_v29 = vadd.f32 0.001, %v433_v8  ;;  %v476_v20 = vmul.f32 %v1932_v53, %v475_v52  ;;  %v552_v31 = vmul.f32 %v2036_v36, %v1978_v59  ;;  %v524_v39 = vmul.f32 0.5, %v523_v18 }
  0xd7   :  { %v2052_v34 = vadd.f32 0.001, %v432_v41  ;;  %v2055_v48 = vpop.eup %1287  ;;  %v542_v25 = vmul.f32 %v2044_v14, %v1985_v26  ;;  %v504_v41 = vmul.f32 0.5, %v503_v15  ;;  %838 = vperm.xlu1 %1269, %v2062_v6   ;;  %v516_v3 = vmul.f32 %v1980_v63, %v515_v61  ;;  %v718_v26 = vld [vmem:[%s3064_s1 + $0x38] sm:$0xff] }
  0xd8   :  { %1289 = vrsqrt.f32 %v2050_v29  ;;  %v266_v8 = vpop.xlane.xlu2 %265  ;;  %v532_v15 = vmul.f32 %v2055_v48, %v1987_v47  ;;  %v480_v52 = vsel %vm479_vm10, %v1932_v53, %v476_v20  ;;  %v2096_v53 = vmul.f32 %v1983_v46, %v1983_v46 }
  0xd9   :  { %v543_v42 = vmul.f32 %v2044_v14, %v542_v25  ;;  %1291 = vrsqrt.f32 %v2052_v34  ;;  %v262_v54 = vpop.xlane.xlu1 %261  ;;  %v389_v25 = vmul.f32 0.0069444445, %v266_v8  ;;  %v2086_v4 = vmul.f32 %v711_v33, %v480_v52 }
  0xda   :  { %v258_v28 = vpop.xlane.xlu0 %257  ;;  %v388_v43 = vmul.f32 0.0069444445, %v262_v54  ;;  %1293 = vrsqrt.f32 %v2059_v57  ;;  %v505_v23 = vsub.f32 1.5, %v504_v41  ;;  %v2100_v61 = vmul.f32 %v2021_v21, %v2021_v21 }
  0xdb   :  { %v387_v32 = vmul.f32 0.0069444445, %v258_v28  ;;  %v544_v30 = vmul.f32 0.5, %v543_v42  ;;  %v437_v44 = vsub.f32 %v389_v25, %v1911_v37  ;;  %v553_v18 = vmul.f32 %v2036_v36, %v552_v31  ;;  %833 = vperm.xlu0 %1268, %v2086_v4  }
  0xdc   :  { %v436_v16 = vsub.f32 %v388_v43, %v1915_v35  ;;  %v533_v37 = vmul.f32 %v2055_v48, %v532_v15  ;;  %v520_v42 = vsel %vm2107_vm12, %v1980_v63, %v516_v3  ;;  %v525_v28 = vsub.f32 1.5, %v524_v39  ;;  %v714_v39 = vld [vmem:[%s3064_s1 + $0x18] sm:$0xff] }
  0xdd   :  { %v435_v0 = vsub.f32 %v387_v32, %v1919_v38  ;;  %v545_v20 = vsub.f32 1.5, %v544_v30  ;;  %v2127_v33 = vadd.f32 0.001, %v437_v44  ;;  %v506_v3 = vmul.f32 %v1990_v62, %v505_v23 }
  0xde   :  { %v2092_v8 = vpop.eup %1289  ;;  %v2115_v43 = vadd.f32 0.001, %v436_v16  ;;  %v2135_v25 = vmul.f32 0.5, %v553_v18  ;;  %v534_v30 = vmul.f32 0.5, %v533_v37  ;;  %v2138_v44 = vmul.f32 %v715_v51, %v520_v42 }
  0xdf   :  { %v2111_v35 = vpop.eup %1291  ;;  %v572_v38 = vmul.f32 %v2092_v8, %v2050_v29  ;;  %v2117_v41 = vadd.f32 0.001, %v435_v0  ;;  %vm508_vm15 = vweird.f32 %v1990_v62  ;;  %v546_v37 = vmul.f32 %v2044_v14, %v545_v20 }
  0xe0   :  { %v278_v54 = vpop.xlane.xlu2 %277  ;;  %v2129_v16 = vpop.eup %1293  ;;  %v562_v31 = vmul.f32 %v2111_v35, %v2052_v34  ;;  %1295 = vrsqrt.f32 %v2115_v43  ;;  %853 = vperm.xlu1 %1269, %v2138_v44   ;;  %vm509_vm1 = vmor %vm507_vm13, %vm508_vm15  ;;  %vm548_vm2 = vweird.f32 %v2044_v14  ;;  %vm528_vm4 = vweird.f32 %v1999_v22 }
  0xe1   :  { %v274_v63 = vpop.xlane.xlu1 %273  ;;  %1297 = vrsqrt.f32 %v2117_v41  ;;  %v573_v52 = vmul.f32 %v2092_v8, %v572_v38  ;;  %v392_v0 = vmul.f32 0.0069444445, %v278_v54  ;;  %v582_v23 = vmul.f32 %v2129_v16, %v2059_v57  ;;  %vm2168_vm3 = vmor %vm547_vm14, %vm548_vm2 }
  0xe2   :  { %v270_v15 = vpop.xlane.xlu0 %269  ;;  %v391_v32 = vmul.f32 0.0069444445, %v274_v63  ;;  %1299 = vrsqrt.f32 %v2127_v33  ;;  %v563_v38 = vmul.f32 %v2111_v35, %v562_v31  ;;  %v510_v42 = vsel %vm509_vm1, %v1990_v62, %v506_v3 }
  0xe3   :  { %v390_v18 = vmul.f32 0.0069444445, %v270_v15  ;;  %v440_v51 = vsub.f32 %v392_v0, %v1936_v55  ;;  %v535_v63 = vsub.f32 1.5, %v534_v30  ;;  %v2156_v21 = vmul.f32 %v714_v39, %v510_v42 }
  0xe4   :  { %v439_v54 = vsub.f32 %v391_v32, %v1940_v58  ;;  %v574_v15 = vmul.f32 0.5, %v573_v52  ;;  %v526_v58 = vmul.f32 %v1999_v22, %v525_v28  ;;  %v550_v3 = vsel %vm2168_vm3, %v2044_v14, %v546_v37 }
  0xe5   :  { %v438_v46 = vsub.f32 %v390_v18, %v1960_v2  ;;  %v2162_v24 = vadd.f32 0.001, %v440_v51  ;;  %848 = vperm.xlu2 %1270, %v2156_v21   ;;  %vm527_vm5 = vweird.f32 %v1944_v60  ;;  %v583_v28 = vmul.f32 %v2129_v16, %v582_v23  ;;  %v717_v51 = vld [vmem:[%s3064_s1 + $0x30] sm:$0xff] }
  0xe6   :  { %v2160_v10 = vpop.eup %1295  ;;  %v2164_v20 = vadd.f32 0.001, %v439_v54  ;;  %v2189_v30 = vmul.f32 0.5, %v563_v38  ;;  %v555_v52 = vsub.f32 1.5, %v2135_v25  ;;  %vm537_vm6 = vweird.f32 %v1987_v47  ;;  %vm2205_vm8 = vmor %vm527_vm5, %vm528_vm4  ;;  %v716_v25 = vld [vmem:[%s3064_s1 + $0x28] sm:$0xff] }
  0xe7   :  { %v2173_v62 = vpop.eup %1297  ;;  %v602_v2 = vmul.f32 %v2160_v10, %v2115_v43  ;;  %v2178_v31 = vadd.f32 0.001, %v438_v46  ;;  %1301 = vrsqrt.f32 %v2162_v24  ;;  %vm577_vm7 = vweird.f32 %v2050_v29 }
  0xe8   :  { %v2192_v46 = vpop.eup %1299  ;;  %1303 = vrsqrt.f32 %v2164_v20  ;;  %v290_v14 = vpop.xlane.xlu2 %289  ;;  %v575_v39 = vsub.f32 1.5, %v574_v15  ;;  %v592_v60 = vmul.f32 %v2173_v62, %v2117_v41  ;;  %v2201_v0 = vmul.f32 %v718_v26, %v550_v3 }
  0xe9   :  { %1305 = vrsqrt.f32 %v2178_v31  ;;  %v286_v23 = vpop.xlane.xlu1 %285  ;;  %vm557_vm9 = vweird.f32 %v1978_v59  ;;  %v603_v37 = vmul.f32 %v2160_v10, %v602_v2  ;;  %v530_v38 = vsel %vm2205_vm8, %v1999_v22, %v526_v58  ;;  %v720_v59 = vld [vmem:[%s3064_s1 + $0x48] sm:$0xff] }
  0xea   :  { %v282_v18 = vpop.xlane.xlu0 %281  ;;  %v536_v42 = vmul.f32 %v2055_v48, %v535_v63  ;;  %vm538_vm10 = vweird.f32 %v2055_v48  ;;  %v2222_v54 = vmul.f32 0.5, %v583_v28  ;;  %v565_v15 = vsub.f32 1.5, %v2189_v30  ;;  %868 = vperm.xlu0 %1268, %v2201_v0  }
  0xeb   :  { %v612_v55 = vmul.f32 %v2192_v46, %v2127_v33  ;;  %vm539_vm11 = vmor %vm537_vm6, %vm538_vm10  ;;  %v395_v22 = vmul.f32 0.0069444445, %v290_v14  ;;  %v2230_v63 = vmul.f32 %v716_v25, %v530_v38  ;;  %v394_v2 = vmul.f32 0.0069444445, %v286_v23  ;;  %v721_v38 = vld [vmem:[%s3064_s1 + $0x50] sm:$0xff] }
  0xec   :  { %v540_v58 = vsel %vm539_vm11, %v2055_v48, %v536_v42  ;;  %v393_v3 = vmul.f32 0.0069444445, %v282_v18  ;;  %v593_v28 = vmul.f32 %v2173_v62, %v592_v60  ;;  %v576_v9 = vmul.f32 %v2092_v8, %v575_v39 }
  0xed   :  { %v2233_v26 = vpop.eup %1301  ;;  %v2236_v30 = vmul.f32 %v717_v51, %v540_v58  ;;  %v443_v32 = vsub.f32 %v395_v22, %v1969_v49  ;;  %v604_v47 = vmul.f32 0.5, %v603_v37  ;;  %858 = vperm.xlu2 %1270, %v2230_v63   ;;  %v442_v14 = vsub.f32 %v394_v2, %v1973_v40  ;;  %v719_v22 = vld [vmem:[%s3064_s1 + $0x40] sm:$0xff] }
  0xee   :  { %v2240_v12 = vpop.eup %1303  ;;  %v441_v48 = vsub.f32 %v393_v3, %v2007_v27  ;;  %vm578_vm12 = vweird.f32 %v2092_v8  ;;  %v613_v60 = vmul.f32 %v2192_v46, %v612_v55  ;;  %v556_v23 = vmul.f32 %v2036_v36, %v555_v52 }
  0xef   :  { %v2246_v25 = vpop.eup %1305  ;;  %v632_v49 = vmul.f32 %v2240_v12, %v2164_v20  ;;  %863 = vperm.xlu1 %1269, %v2236_v30   ;;  %v2252_v39 = vadd.f32 0.001, %v443_v32  ;;  %v2257_v18 = vadd.f32 0.001, %v442_v14  ;;  %vm2263_vm13 = vmor %vm577_vm7, %vm578_vm12  ;;  %vm558_vm14 = vweird.f32 %v2036_v36 }
  0xf0   :  { %v622_v40 = vmul.f32 %v2246_v25, %v2178_v31  ;;  %v2259_v27 = vadd.f32 0.001, %v441_v48  ;;  %vm567_vm15 = vweird.f32 %v2052_v34  ;;  %vm607_vm1 = vweird.f32 %v2115_v43  ;;  %v302_v58 = vpop.xlane.xlu2 %301  ;;  %vm559_vm3 = vmor %vm557_vm9, %vm558_vm14 }
  0xf1   :  { %v2273_v52 = vmul.f32 0.5, %v593_v28  ;;  %v580_v29 = vsel %vm2263_vm13, %v2092_v8, %v576_v9  ;;  %v585_v42 = vsub.f32 1.5, %v2222_v54  ;;  %v605_v51 = vsub.f32 1.5, %v604_v47  ;;  %v298_v8 = vpop.xlane.xlu1 %297 }
  0xf2   :  { %v642_v55 = vmul.f32 %v2233_v26, %v2162_v24  ;;  %1307 = vrsqrt.f32 %v2257_v18  ;;  %vm587_vm2 = vweird.f32 %v2059_v57  ;;  %v2286_v2 = vmul.f32 0.5, %v613_v60  ;;  %v294_v54 = vpop.xlane.xlu0 %293  ;;  %v723_v57 = vld [vmem:[%s3064_s1 + $0x60] sm:$0xff] }
  0xf3   :  { %v633_v3 = vmul.f32 %v2240_v12, %v632_v49  ;;  %1309 = vrsqrt.f32 %v2259_v27  ;;  %v2290_v9 = vmul.f32 %v721_v38, %v580_v29  ;;  %v623_v28 = vmul.f32 %v2246_v25, %v622_v40 }
  0xf4   :  { %1311 = vrsqrt.f32 %v2252_v39  ;;  %v560_v32 = vsel %vm559_vm3, %v2036_v36, %v556_v23  ;;  %v566_v47 = vmul.f32 %v2111_v35, %v565_v15  ;;  %v595_v14 = vsub.f32 1.5, %v2273_v52 }
  0xf5   :  { %883 = vperm.xlu0 %1268, %v2290_v9   ;;  %v2302_v48 = vmul.f32 %v719_v22, %v560_v32  ;;  %vm568_vm4 = vweird.f32 %v2111_v35  ;;  %v398_v60 = vmul.f32 0.0069444445, %v302_v58  ;;  %v643_v49 = vmul.f32 %v2233_v26, %v642_v55 }
  0xf6   :  { %vm569_vm5 = vmor %vm567_vm15, %vm568_vm4  ;;  %v397_v36 = vmul.f32 0.0069444445, %v298_v8  ;;  %v396_v15 = vmul.f32 0.0069444445, %v294_v54  ;;  %v606_v23 = vmul.f32 %v2160_v10, %v605_v51  ;;  %vm597_vm6 = vweird.f32 %v2117_v41 }
  0xf7   :  { %v634_v40 = vmul.f32 0.5, %v633_v3  ;;  %873 = vperm.xlu2 %1270, %v2302_v48   ;;  %v570_v37 = vsel %vm569_vm5, %v2111_v35, %v566_v47  ;;  %v446_v38 = vsub.f32 %v398_v60, %v2048_v45  ;;  %vm608_vm7 = vweird.f32 %v2160_v10  ;;  %v724_v45 = vld [vmem:[%s3064_s1 + $0x68] sm:$0xff]  ;;  %v722_v47 = vld [vmem:[%s3064_s1 + $0x58] sm:$0xff] }
  0xf8   :  { %v2317_v52 = vpop.eup %1307  ;;  %v624_v29 = vmul.f32 0.5, %v623_v28  ;;  %v2319_v34 = vmul.f32 %v720_v59, %v570_v37  ;;  %v445_v55 = vsub.f32 %v397_v36, %v2096_v53  ;;  %v444_v51 = vsub.f32 %v396_v15, %v2100_v61  ;;  %vm2325_vm8 = vmor %vm607_vm1, %vm608_vm7 }
  0xf9   :  { %v2332_v35 = vpop.eup %1309  ;;  %vm617_vm9 = vweird.f32 %v2127_v33  ;;  %v662_v58 = vmul.f32 %v2317_v52, %v2257_v18  ;;  %v610_v53 = vsel %vm2325_vm8, %v2160_v10, %v606_v23  ;;  %v586_v61 = vmul.f32 %v2129_v16, %v585_v42  ;;  %v725_v33 = vld [vmem:[%s3064_s1 + $0x70] sm:$0xff] }
  0xfa   :  { %vm588_vm10 = vweird.f32 %v2129_v16  ;;  %v2342_v43 = vpop.eup %1311  ;;  %v652_v3 = vmul.f32 %v2332_v35, %v2259_v27  ;;  %878 = vperm.xlu1 %1269, %v2319_v34   ;;  %v2347_v8 = vadd.f32 0.001, %v446_v38  ;;  %v2349_v54 = vadd.f32 0.001, %v445_v55 }
  0xfb   :  { %v2351_v28 = vadd.f32 0.001, %v444_v51  ;;  %v635_v32 = vsub.f32 1.5, %v634_v40  ;;  %vm637_vm11 = vweird.f32 %v2164_v20  ;;  %v663_v10 = vmul.f32 %v2317_v52, %v662_v58  ;;  %vm589_vm12 = vmor %vm587_vm2, %vm588_vm10 }
  0xfc   :  { %v2355_v42 = vmul.f32 %v724_v45, %v610_v53  ;;  %v615_v59 = vsub.f32 1.5, %v2286_v2  ;;  %v625_v60 = vsub.f32 1.5, %v624_v29  ;;  %v653_v36 = vmul.f32 %v2332_v35, %v652_v3 }
  0xfd   :  { %1313 = vrsqrt.f32 %v2349_v54  ;;  %v672_v15 = vmul.f32 %v2342_v43, %v2252_v39  ;;  %v664_v23 = vmul.f32 0.5, %v663_v10  ;;  %v590_v2 = vsel %vm589_vm12, %v2129_v16, %v586_v61  ;;  %v728_v61 = vld [vmem:[%s3064_s1 + $0x88] sm:$0xff] }
  0xfe   :  { %1315 = vrsqrt.f32 %v2351_v28  ;;  %898 = vperm.xlu0 %1268, %v2355_v42   ;;  %v644_v40 = vmul.f32 0.5, %v643_v49  ;;  %v2373_v37 = vmul.f32 %v722_v47, %v590_v2  ;;  %v596_v38 = vmul.f32 %v2173_v62, %v595_v14  ;;  %v727_v14 = vld [vmem:[%s3064_s1 + $0x80] sm:$0xff] }
  0xff   :  { %1317 = vrsqrt.f32 %v2347_v8  ;;  %v665_v29 = vsub.f32 1.5, %v664_v23  ;;  %vm598_vm13 = vweird.f32 %v2173_v62  ;;  %v636_v55 = vmul.f32 %v2240_v12, %v635_v32 }
 0x100   :  { %vm638_vm14 = vweird.f32 %v2240_v12  ;;  %vm627_vm15 = vweird.f32 %v2178_v31  ;;  %v654_v16 = vmul.f32 0.5, %v653_v36  ;;  %888 = vperm.xlu2 %1270, %v2373_v37   ;;  %vm599_vm1 = vmor %vm597_vm6, %vm598_vm13  ;;  %v616_v49 = vmul.f32 %v2192_v46, %v615_v59 }
 0x101   :  { %vm618_vm2 = vweird.f32 %v2192_v46  ;;  %v673_v51 = vmul.f32 %v2342_v43, %v672_v15  ;;  %v600_v22 = vsel %vm599_vm1, %v2173_v62, %v596_v38  ;;  %vm639_vm3 = vmor %vm637_vm11, %vm638_vm14  ;;  %v626_v45 = vmul.f32 %v2246_v25, %v625_v60  ;;  %v726_v15 = vld [vmem:[%s3064_s1 + $0x78] sm:$0xff] }
 0x102   :  { %vm628_vm4 = vweird.f32 %v2246_v25  ;;  %v2399_v58 = vmul.f32 %v723_v57, %v600_v22  ;;  %v640_v53 = vsel %vm639_vm3, %v2240_v12, %v636_v55  ;;  %vm2404_vm5 = vmor %vm617_vm9, %vm618_vm2  ;;  %v666_v62 = vmul.f32 %v2317_v52, %v665_v29 }
 0x103   :  { %v2397_v41 = vpop.eup %1313  ;;  %vm668_vm6 = vweird.f32 %v2317_v52  ;;  %v645_v3 = vsub.f32 1.5, %v644_v40  ;;  %v2414_v10 = vmul.f32 %v727_v14, %v640_v53  ;;  %v620_v12 = vsel %vm2404_vm5, %v2192_v46, %v616_v49  ;;  %vm2432_vm8 = vmor %vm627_vm15, %vm628_vm4 }
 0x104   :  { %v2410_v20 = vpop.eup %1315  ;;  %v692_v32 = vmul.f32 %v2397_v41, %v2349_v54  ;;  %vm667_vm7 = vweird.f32 %v2257_v18  ;;  %v655_v59 = vsub.f32 1.5, %v654_v16  ;;  %893 = vperm.xlu1 %1269, %v2399_v58   ;;  %v630_v18 = vsel %vm2432_vm8, %v2246_v25, %v626_v45  ;;  %v730_v25 = vld [vmem:[%s3064_s1 + $0x98] sm:$0xff] }
 0x105   :  { %v2422_v47 = vpop.eup %1317  ;;  %v682_v60 = vmul.f32 %v2410_v20, %v2351_v28  ;;  %vm2446_vm9 = vmor %vm667_vm7, %vm668_vm6  ;;  %v674_v23 = vmul.f32 0.5, %v673_v51  ;;  %v2451_v40 = vmul.f32 %v725_v33, %v620_v12  ;;  %v646_v55 = vmul.f32 %v2233_v26, %v645_v3 }
 0x106   :  { %v693_v36 = vmul.f32 %v2397_v41, %v692_v32  ;;  %913 = vperm.xlu0 %1268, %v2414_v10   ;;  %v670_v38 = vsel %vm2446_vm9, %v2317_v52, %v666_v62  ;;  %v702_v29 = vmul.f32 %v2422_v47, %v2347_v8  ;;  %vm648_vm10 = vweird.f32 %v2233_v26 }
 0x107   :  { %v683_v2 = vmul.f32 %v2410_v20, %v682_v60  ;;  %vm647_vm11 = vweird.f32 %v2162_v24  ;;  %v2465_v16 = vmul.f32 %v726_v15, %v630_v18  ;;  %v656_v52 = vmul.f32 %v2332_v35, %v655_v59  ;;  %v731_v18 = vld [vmem:[%s3064_s1 + $0xa0] sm:$0xff]  ;;  %v732_v15 = vld [vmem:[%s3064_s1 + $0xa8] sm:$0xff] }
 0x108   :  { %v694_v57 = vmul.f32 0.5, %v693_v36  ;;  %903 = vperm.xlu2 %1270, %v2451_v40   ;;  %v2468_v51 = vmul.f32 %v730_v25, %v670_v38  ;;  %vm658_vm12 = vweird.f32 %v2332_v35  ;;  %vm657_vm13 = vweird.f32 %v2259_v27  ;;  %vm2472_vm14 = vmor %vm647_vm11, %vm648_vm10 }
 0x109   :  { %v684_v49 = vmul.f32 0.5, %v683_v2  ;;  %vm698_vm15 = vweird.f32 %v2397_v41  ;;  %v675_v24 = vsub.f32 1.5, %v674_v23  ;;  %v703_v45 = vmul.f32 %v2422_v47, %v702_v29  ;;  %vm659_vm2 = vmor %vm657_vm13, %vm658_vm12 }
 0x10a   :  { %v695_v14 = vsub.f32 1.5, %v694_v57  ;;  %v650_v53 = vsel %vm2472_vm14, %v2233_v26, %v646_v55  ;;  %vm697_vm1 = vweird.f32 %v2349_v54  ;;  %v660_v3 = vsel %vm659_vm2, %v2332_v35, %v656_v52  ;;  %v729_v26 = vld [vmem:[%s3064_s1 + $0x90] sm:$0xff] }
 0x10b   :  { %v685_v27 = vsub.f32 1.5, %v684_v49  ;;  %vm699_vm3 = vmor %vm697_vm1, %vm698_vm15  ;;  %v2492_v32 = vmul.f32 %v728_v61, %v650_v53  ;;  %v733_v54 = vld [vmem:[%s3064_s1 + $0xb0] sm:$0xff]  ;;  %v704_v33 = vmul.f32 0.5, %v703_v45  ;;  %v676_v59 = vmul.f32 %v2342_v43, %v675_v24  ;;  %v3120_v53 = vld [vmem:[#allocation2_spill] sm:$0xff] }
 0x10c   :  { %v696_v62 = vmul.f32 %v2397_v41, %v695_v14  ;;  %908 = vperm.xlu1 %1269, %v2465_v16   ;;  %vm678_vm4 = vweird.f32 %v2342_v43  ;;  %v2501_v35 = vmul.f32 %v729_v26, %v660_v3  ;;  %vm677_vm5 = vweird.f32 %v2252_v39  ;;  %v3119_v24 = vld [vmem:[#allocation4_spill] sm:$0xff]  ;;  %v768_v26 = vld [vmem:[%s3065_s2 + $0x48] sm:$0xff] }
 0x10d   :  { %v686_v46 = vmul.f32 %v2410_v20, %v685_v27  ;;  %vm688_vm6 = vweird.f32 %v2410_v20  ;;  %vm679_vm7 = vmor %vm677_vm5, %vm678_vm4  ;;  %vm687_vm8 = vweird.f32 %v2351_v28  ;;  %vm708_vm10 = vweird.f32 %v2422_v47  ;;  %v3121_v27 = vld [vmem:[#allocation5_spill] sm:$0xff] }
 0x10e   :  { %928 = vperm.xlu0 %1268, %v2468_v51   ;;  %v700_v12 = vsel %vm699_vm3, %v2397_v41, %v696_v62  ;;  %v705_v41 = vsub.f32 1.5, %v704_v33  ;;  %v680_v36 = vsel %vm679_vm7, %v2342_v43, %v676_v59  ;;  %vm689_vm9 = vmor %vm687_vm8, %vm688_vm6  ;;  %v784_v43 = vmul.f32 %v2062_v6, %v1838_v19  ;;  %v734_v19 = vld [vmem:[%s3064_s1 + $0xb8] sm:$0xff]  ;;  %v3123_v59 = vld [vmem:[#allocation3_spill] sm:$0xff] }
 0x10f   :  { %v2504_v60 = vmul.f32 %v733_v54, %v700_v12  ;;  %v690_v39 = vsel %vm689_vm9, %v2410_v20, %v686_v46  ;;  %v2519_v31 = vmul.f32 %v731_v18, %v680_v36  ;;  %v760_v20 = vld [vmem:[%s3065_s2 + $0x8] sm:$0xff]  ;;  %vm707_vm11 = vweird.f32 %v2347_v8  ;;  %v759_v8 = vld [vmem:[%s3065_s2] sm:$0xff]  ;;  %v3124_v18 = vld [vmem:[#allocation8_spill] sm:$0xff] }
 0x110   :  { %918 = vperm.xlu2 %1270, %v2492_v32   ;;  %v706_v28 = vmul.f32 %v2422_v47, %v705_v41  ;;  %v2526_v23 = vmul.f32 %v732_v15, %v690_v39  ;;  %vm709_vm12 = vmor %vm707_vm11, %vm708_vm10  ;;  %v808_v2 = vsub.f32 %v760_v20, %v784_v43  ;;  %v783_v25 = vmul.f32 %v2086_v4, %v1836_v50  ;;  %v761_v50 = vld [vmem:[%s3065_s2 + $0x10] sm:$0xff]  ;;  %v3122_v12 = vld [vmem:[#allocation7_spill] sm:$0xff] }
 0x111   :  { %v787_v29 = vmul.f32 %v2138_v44, %v1840_v56  ;;  %v785_v55 = vmul.f32 %v2039_v7, %v1834_v5  ;;  %v786_v56 = vmul.f32 %v2156_v21, %v1850_v13  ;;  %v762_v44 = vld [vmem:[%s3065_s2 + $0x18] sm:$0xff]  ;;  %v790_v14 = vmul.f32 %v2201_v0, %v1860_v11  ;;  %v764_v13 = vld [vmem:[%s3065_s2 + $0x28] sm:$0xff]  ;;  %v765_v0 = vld [vmem:[%s3065_s2 + $0x30] sm:$0xff] }
 0x112   :  { %v710_v38 = vsel %vm709_vm12, %v2422_v47, %v706_v28  ;;  %v763_v47 = vld [vmem:[%s3065_s2 + $0x20] sm:$0xff]  ;;  %v807_v57 = vsub.f32 %v759_v8, %v783_v25  ;;  %v766_v5 = vld [vmem:[%s3065_s2 + $0x38] sm:$0xff]  ;;  %v788_v49 = vmul.f32 %v2230_v63, %v1846_v1  ;;  %v789_v11 = vmul.f32 %v2236_v30, %v1868_v17  ;;  %v769_v1 = vld [vmem:[%s3065_s2 + $0x50] sm:$0xff] }
 0x113   :  { %v2537_v6 = vmul.f32 %v734_v19, %v710_v38  ;;  %v811_v52 = vsub.f32 %v763_v47, %v787_v29  ;;  %v809_v4 = vsub.f32 %v761_v50, %v785_v55  ;;  %v810_v7 = vsub.f32 %v762_v44, %v786_v56  ;;  %v767_v17 = vld [vmem:[%s3065_s2 + $0x40] sm:$0xff]  ;;  %v772_v54 = vld [vmem:[%s3065_s2 + $0x68] sm:$0xff]  ;;  %v774_v29 = vld [vmem:[%s3065_s2 + $0x78] sm:$0xff] }
 0x114   :  { %923 = vperm.xlu1 %1269, %v2501_v35   ;;  %v814_v22 = vsub.f32 %v766_v5, %v790_v14  ;;  %v812_v21 = vsub.f32 %v764_v13, %v788_v49  ;;  %v793_v45 = vmul.f32 %v2290_v9, %v3119_v24  ;;  %v813_v63 = vsub.f32 %v765_v0, %v789_v11  ;;  %v771_v39 = vld [vmem:[%s3065_s2 + $0x60] sm:$0xff]  ;;  %v3128_v47 = vld [vmem:[#allocation13_spill] sm:$0xff]  ;;  %v3131_v49 = vld [vmem:[#allocation16_spill] sm:$0xff] }
 0x115   :  { %v791_v61 = vmul.f32 %v2302_v48, %v3120_v53  ;;  %v792_v9 = vmul.f32 %v2319_v34, %v3121_v27  ;;  %v796_v48 = vmul.f32 %v2355_v42, %v3122_v12  ;;  %v794_v46 = vmul.f32 %v2373_v37, %v3123_v59  ;;  %v770_v34 = vld [vmem:[%s3065_s2 + $0x58] sm:$0xff]  ;;  %v3125_v15 = vld [vmem:[#allocation10_spill] sm:$0xff]  ;;  %v3132_v11 = vld [vmem:[#allocation12_spill] sm:$0xff] }
 0x116   :  { %943 = vperm.xlu0 %1268, %v2504_v60   ;;  %v817_v62 = vsub.f32 %v769_v1, %v793_v45  ;;  %v795_v42 = vmul.f32 %v2399_v58, %v3124_v18  ;;  %v799_v43 = vmul.f32 %v2414_v10, %v3125_v15  ;;  %v775_v28 = vld [vmem:[%s3065_s2 + $0x80] sm:$0xff]  ;;  %v773_v58 = vld [vmem:[%s3065_s2 + $0x70] sm:$0xff]  ;;  %v3127_v10 = vld [vmem:[#allocation11_spill] sm:$0xff] }
 0x117   :  { %v815_v30 = vsub.f32 %v767_v17, %v791_v61  ;;  %v816_v33 = vsub.f32 %v768_v26, %v792_v9  ;;  %v820_v41 = vsub.f32 %v772_v54, %v796_v48  ;;  %v818_v36 = vsub.f32 %v770_v34, %v794_v46  ;;  %v778_v55 = vld [vmem:[%s3065_s2 + $0x98] sm:$0xff]  ;;  %v779_v24 = vld [vmem:[%s3065_s2 + $0xa0] sm:$0xff]  ;;  %v780_v53 = vld [vmem:[%s3065_s2 + $0xa8] sm:$0xff] }
 0x118   :  { %933 = vperm.xlu2 %1270, %v2519_v31   ;;  %v819_v20 = vsub.f32 %v771_v39, %v795_v42  ;;  %v823_v19 = vsub.f32 %v775_v28, %v799_v43  ;;  %v798_v8 = vmul.f32 %v2465_v16, %v3127_v10  ;;  %v3129_v50 = vld [vmem:[#allocation9_spill] sm:$0xff]  ;;  %v776_v16 = vld [vmem:[%s3065_s2 + $0x88] sm:$0xff]  ;;  %v1319_v42 = vld [vmem:[%s3063_s0 + $0x20] sm:$0xff] }
 0x119   :  { %v3133_v1 = vld [vmem:[#allocation17_spill] sm:$0xff]  ;;  %v3134_v17 = vld [vmem:[#allocation15_spill] sm:$0xff] }
 0x11a   :  { %v782_v27 = vld [vmem:[%s3065_s2 + $0xb8] sm:$0xff]  ;;  %v1320_v15 = vld [vmem:[%s3063_s0 + $0x28] sm:$0xff] }
 0x11c   :  { %938 = vperm.xlu1 %1269, %v2526_v23  }
 0x11e   :  { %1006 = vperm.xlu0 %1268, %v808_v2   ;;  %v3126_v2 = vld [vmem:[#allocation6_spill] sm:$0xff] }
 0x11f   :  { %v797_v38 = vmul.f32 %v2451_v40, %v3126_v2 }
 0x120   :  { %948 = vperm.xlu2 %1270, %v2537_v6  }
 0x121   :  { %v821_v25 = vsub.f32 %v773_v58, %v797_v38 }
 0x124   :  { %1001 = vperm.xlu1 %1269, %v807_v57   ;;  %v802_v57 = vmul.f32 %v2468_v51, %v3128_v47  ;;  %v3130_v51 = vld [vmem:[#allocation14_spill] sm:$0xff] }
 0x125   :  { %v801_v14 = vmul.f32 %v2501_v35, %v3130_v51  ;;  %v803_v35 = vmul.f32 %v2519_v31, %v3132_v11 }
 0x126   :  { %1021 = vperm.xlu0 %1268, %v811_v52   ;;  %v822_v52 = vsub.f32 %v774_v29, %v798_v8  ;;  %v826_v56 = vsub.f32 %v778_v55, %v802_v57  ;;  %v1322_v8 = vld [vmem:[%s3063_s0 + $0x58] sm:$0xff] }
 0x128   :  { %1011 = vperm.xlu2 %1270, %v809_v4   ;;  %v800_v4 = vmul.f32 %v2492_v32, %v3129_v50  ;;  %v805_v32 = vmul.f32 %v2504_v60, %v3131_v49  ;;  %v827_v60 = vsub.f32 %v779_v24, %v803_v35  ;;  %v1325_v49 = vld [vmem:[%s3063_s0 + $0x80] sm:$0xff] }
 0x12a   :  { %v824_v44 = vsub.f32 %v776_v16, %v800_v4  ;;  %v1323_v4 = vld [vmem:[%s3063_s0 + $0x10] sm:$0xff]  ;;  %v1324_v16 = vld [vmem:[%s3063_s0 + $0x18] sm:$0xff] }
 0x12c   :  { %1016 = vperm.xlu1 %1269, %v810_v7   ;;  %v777_v7 = vld [vmem:[%s3065_s2 + $0x90] sm:$0xff] }
 0x12d   :  { %v2587_v3 = vpop.permute.xlu2 %843 }
 0x12e   :  { %1036 = vperm.xlu0 %1268, %v814_v22   ;;  %v781_v22 = vld [vmem:[%s3065_s2 + $0xb0] sm:$0xff]  ;;  %v955_v39 = vmul.f32 %v1319_v42, %v2587_v3  ;;  %v956_v43 = vmul.f32 %v1320_v15, %v2587_v3 }
 0x12f   :  { %v829_v0 = vsub.f32 %v781_v22, %v805_v32  ;;  %v1321_v3 = vld [vmem:[%s3063_s0 + $0x50] sm:$0xff]  ;;  %v1326_v32 = vld [vmem:[%s3063_s0 + $0x88] sm:$0xff] }
 0x130   :  { %1026 = vperm.xlu2 %1270, %v812_v21   ;;  %v825_v21 = vsub.f32 %v777_v7, %v801_v14 }
 0x134   :  { %1031 = vperm.xlu1 %1269, %v813_v63   ;;  %v804_v63 = vmul.f32 %v2526_v23, %v3133_v1 }
 0x136   :  { %1051 = vperm.xlu0 %1268, %v817_v62   ;;  %v828_v31 = vsub.f32 %v780_v53, %v804_v63  ;;  %v1328_v63 = vld [vmem:[%s3063_s0 + $0x8] sm:$0xff] }
 0x138   :  { %1041 = vperm.xlu2 %1270, %v815_v30   ;;  %v806_v30 = vmul.f32 %v2537_v6, %v3134_v17  ;;  %v1329_v17 = vld [vmem:[%s3063_s0 + $0x40] sm:$0xff] }
 0x13a   :  { %v830_v23 = vsub.f32 %v782_v27, %v806_v30  ;;  %v1330_v27 = vld [vmem:[%s3063_s0 + $0x48] sm:$0xff] }
 0x13c   :  { %1046 = vperm.xlu1 %1269, %v816_v33  }
 0x13e   :  { %1066 = vperm.xlu0 %1268, %v820_v41  }
 0x13f   :  { %v2609_v37 = vpop.permute.xlu2 %848 }
 0x140   :  { %1056 = vperm.xlu2 %1270, %v818_v36  }
 0x144   :  { %1061 = vperm.xlu1 %1269, %v819_v20  }
 0x146   :  { %1081 = vperm.xlu0 %1268, %v823_v19  }
 0x147   :  { %v2626_v40 = vpop.permute.xlu2 %858 }
 0x148   :  { %1071 = vperm.xlu2 %1270, %v821_v25   ;;  %v961_v10 = vmul.f32 %v1321_v3, %v2626_v40  ;;  %v962_v29 = vmul.f32 %v1322_v8, %v2626_v40 }
 0x149   :  { %v2638_v5 = vpop.permute.xlu1 %838 }
 0x14c   :  { %1076 = vperm.xlu1 %1269, %v822_v52  }
 0x14d   :  { %v2655_v45 = vpop.permute.xlu0 %833 }
 0x14e   :  { %1096 = vperm.xlu0 %1268, %v826_v56   ;;  %v953_v56 = vmul.f32 %v1323_v4, %v2638_v5 }
 0x150   :  { %1086 = vperm.xlu2 %1270, %v824_v44   ;;  %v954_v44 = vmul.f32 %v1324_v16, %v2638_v5  ;;  %v1335_v16 = vld [vmem:[%s3063_s0 + $0x70] sm:$0xff] }
 0x151   :  { %v2648_v13 = vpop.permute.xlu2 %873 }
 0x152   :  { %v2662_v61 = vpop.permute.xlu1 %853  ;;  %v967_v5 = vmul.f32 %v1325_v49, %v2648_v13  ;;  %v968_v22 = vmul.f32 %v1326_v32, %v2648_v13  ;;  %v952_v13 = vmul.f32 %v1328_v63, %v2655_v45 }
 0x153   :  { %v959_v30 = vmul.f32 %v1329_v17, %v2662_v61  ;;  %v1340_v17 = vld [vmem:[%s3063_s0 + $0x68] sm:$0xff] }
 0x154   :  { %1091 = vperm.xlu1 %1269, %v825_v21  }
 0x156   :  { %1111 = vperm.xlu0 %1268, %v829_v0  }
 0x158   :  { %1101 = vperm.xlu2 %1270, %v827_v60   ;;  %v1327_v60 = vld [vmem:[%s3063_s0] sm:$0xff] }
 0x159   :  { %v951_v1 = vmul.f32 %v1327_v60, %v2655_v45 }
 0x15a   :  { %v2664_v62 = vpop.permute.xlu2 %888 }
 0x15c   :  { %1106 = vperm.xlu1 %1269, %v828_v31   ;;  %v2671_v9 = vpop.permute.xlu0 %868 }
 0x160   :  { %1116 = vperm.xlu2 %1270, %v830_v23   ;;  %v960_v23 = vmul.f32 %v1330_v27, %v2662_v61 }
 0x161   :  { %v2675_v12 = vpop.permute.xlu1 %863 }
 0x162   :  { %v2673_v26 = vpop.permute.xlu2 %903 }
 0x167   :  { %v2677_v48 = vpop.permute.xlu0 %883 }
 0x16a   :  { %v2679_v54 = vpop.permute.xlu2 %918 }
 0x16c   :  { %v2681_v33 = vpop.permute.xlu1 %878 }
 0x170   :  { %v2683_v6 = vpop.permute.xlu0 %898 }
 0x172   :  { %v2685_v59 = vpop.permute.xlu2 %933 }
 0x176   :  { %v2687_v46 = vpop.permute.xlu1 %893 }
 0x178   :  { %v2689_v41 = vpop.permute.xlu0 %913 }
 0x17a   :  { %v2691_v34 = vpop.permute.xlu2 %948 }
 0x17e   :  { %v2693_v36 = vpop.permute.xlu1 %908 }
 0x180   :  { %v2695_v18 = vpop.permute.xlu0 %928 }
 0x182   :  { %v1012_v28 = vpop.permute.xlu2 %1011 }
 0x183   :  { %v1123_v20 = vadd.f32 %v1012_v28, %v955_v39  ;;  %v1124_v2 = vadd.f32 %v1012_v28, %v956_v43 }
 0x185   :  { %v1171_v38 = vmax.f32 %v1123_v20, 0.0  ;;  %v1172_v19 = vmax.f32 %v1124_v2, 0.0  ;;  %v1331_v20 = vld [vmem:[%s3063_s0 + $0xb0] sm:$0xff]  ;;  %v1332_v2 = vld [vmem:[%s3063_s0 + $0xb8] sm:$0xff] }
 0x186   :  { %v2705_v58 = vpop.permute.xlu1 %923  ;;  %v973_v61 = vmul.f32 %v1331_v20, %v2664_v62 }
 0x187   :  { %1219 = vst [vmem:[%s3066_s3 + $0x20] sm:$0xff] %v1171_v38  ;;  %v974_v38 = vmul.f32 %v1332_v2, %v2664_v62  ;;  %v1333_v62 = vld [vmem:[%s3063_s0 + $0x30] sm:$0xff] }
 0x188   :  { %v2710_v25 = vpop.permute.xlu0 %943  ;;  %1220 = vst.msk [vmem:[%s3066_s3 + $0x28] sm:$0xff] %vm62_vm0, %v1172_v19  ;;  %v1343_v2 = vld [vmem:[%s3063_s0 + $0x110] sm:$0xff] }
 0x18a   :  { %v1027_v47 = vpop.permute.xlu2 %1026 }
 0x18b   :  { %v1129_v57 = vadd.f32 %v1027_v47, %v961_v10  ;;  %v1130_v55 = vadd.f32 %v1027_v47, %v962_v29 }
 0x18d   :  { %v1177_v52 = vmax.f32 %v1129_v57, 0.0  ;;  %v1178_v50 = vmax.f32 %v1130_v55, 0.0  ;;  %v957_v55 = vmul.f32 %v1333_v62, %v2609_v37 }
 0x18e   :  { %v2732_v51 = vpop.permute.xlu1 %938 }
 0x18f   :  { %1225 = vst [vmem:[%s3066_s3 + $0x50] sm:$0xff] %v1177_v52  ;;  %v1334_v52 = vld [vmem:[%s3063_s0 + $0x38] sm:$0xff] }
 0x190   :  { %v1007_v40 = vpop.permute.xlu0 %1006  ;;  %1226 = vst.msk [vmem:[%s3066_s3 + $0x58] sm:$0xff] %vm62_vm0, %v1178_v50  ;;  %v958_v50 = vmul.f32 %v1334_v52, %v2609_v37 }
 0x191   :  { %v1121_v14 = vadd.f32 %v1007_v40, %v953_v56  ;;  %v1122_v7 = vadd.f32 %v1007_v40, %v954_v44  ;;  %v965_v44 = vmul.f32 %v1335_v16, %v2671_v9  ;;  %v1336_v40 = vld [vmem:[%s3063_s0 + $0x78] sm:$0xff] }
 0x192   :  { %v1042_v21 = vpop.permute.xlu2 %1041 }
 0x193   :  { %v1169_v11 = vmax.f32 %v1121_v14, 0.0  ;;  %v1170_v35 = vmax.f32 %v1122_v7, 0.0  ;;  %v1135_v0 = vadd.f32 %v1042_v21, %v967_v5  ;;  %v1136_v24 = vadd.f32 %v1042_v21, %v968_v22  ;;  %v1337_v22 = vld [vmem:[%s3063_s0 + $0xe0] sm:$0xff] }
 0x194   :  { %v966_v14 = vmul.f32 %v1336_v40, %v2671_v9  ;;  %v979_v21 = vmul.f32 %v1337_v22, %v2673_v26 }
 0x195   :  { %1217 = vst [vmem:[%s3066_s3 + $0x10] sm:$0xff] %v1169_v11  ;;  %v1183_v53 = vmax.f32 %v1135_v0, 0.0  ;;  %v1184_v31 = vmax.f32 %v1136_v24, 0.0  ;;  %v1338_v11 = vld [vmem:[%s3063_s0 + $0xe8] sm:$0xff] }
 0x196   :  { %1218 = vst.msk [vmem:[%s3066_s3 + $0x18] sm:$0xff] %vm62_vm0, %v1170_v35  ;;  %v1002_v45 = vpop.permute.xlu1 %1001  ;;  %v980_v35 = vmul.f32 %v1338_v11, %v2673_v26  ;;  %v1339_v26 = vld [vmem:[%s3063_s0 + $0x60] sm:$0xff] }
 0x197   :  { %1231 = vst [vmem:[%s3066_s3 + $0x80] sm:$0xff] %v1183_v53  ;;  %v1119_v42 = vadd.f32 %v1002_v45, %v951_v1  ;;  %v1120_v39 = vadd.f32 %v1002_v45, %v952_v13  ;;  %v1341_v45 = vld [vmem:[%s3063_s0 + $0xa0] sm:$0xff] }
 0x198   :  { %v1022_v15 = vpop.permute.xlu0 %1021  ;;  %1232 = vst.msk [vmem:[%s3066_s3 + $0x88] sm:$0xff] %vm62_vm0, %v1184_v31  ;;  %v963_v31 = vmul.f32 %v1339_v26, %v2675_v12  ;;  %v1352_v26 = vld [vmem:[%s3063_s0 + $0xc8] sm:$0xff] }
 0x199   :  { %v1127_v43 = vadd.f32 %v1022_v15, %v959_v30  ;;  %v1128_v28 = vadd.f32 %v1022_v15, %v960_v23  ;;  %v1167_v19 = vmax.f32 %v1119_v42, 0.0  ;;  %v1168_v3 = vmax.f32 %v1120_v39, 0.0  ;;  %v1342_v39 = vld [vmem:[%s3063_s0 + $0xa8] sm:$0xff] }
 0x19a   :  { %v1057_v10 = vpop.permute.xlu2 %1056  ;;  %v964_v30 = vmul.f32 %v1340_v17, %v2675_v12  ;;  %v971_v42 = vmul.f32 %v1341_v45, %v2677_v48  ;;  %v972_v15 = vmul.f32 %v1342_v39, %v2677_v48  ;;  %v1354_v45 = vld [vmem:[%s3063_s0 + $0x108] sm:$0xff] }
 0x19b   :  { %v1175_v8 = vmax.f32 %v1127_v43, 0.0  ;;  %v1176_v29 = vmax.f32 %v1128_v28, 0.0  ;;  %1215 = vst [vmem:[%s3066_s3] sm:$0xff] %v1167_v19  ;;  %v1141_v47 = vadd.f32 %v1057_v10, %v973_v61  ;;  %v1142_v57 = vadd.f32 %v1057_v10, %v974_v38  ;;  %v1344_v19 = vld [vmem:[%s3063_s0 + $0x118] sm:$0xff] }
 0x19c   :  { %1216 = vst.msk [vmem:[%s3066_s3 + $0x8] sm:$0xff] %vm62_vm0, %v1168_v3  ;;  %v985_v38 = vmul.f32 %v1343_v2, %v2679_v54  ;;  %v986_v3 = vmul.f32 %v1344_v19, %v2679_v54  ;;  %v1345_v54 = vld [vmem:[%s3063_s0 + $0x90] sm:$0xff] }
 0x19d   :  { %v1189_v4 = vmax.f32 %v1141_v47, 0.0  ;;  %v1190_v56 = vmax.f32 %v1142_v57, 0.0  ;;  %1223 = vst [vmem:[%s3066_s3 + $0x40] sm:$0xff] %v1175_v8  ;;  %v969_v52 = vmul.f32 %v1345_v54, %v2681_v33 }
 0x19e   :  { %v1017_v7 = vpop.permute.xlu1 %1016  ;;  %1224 = vst.msk [vmem:[%s3066_s3 + $0x48] sm:$0xff] %vm62_vm0, %v1176_v29 }
 0x19f   :  { %1237 = vst [vmem:[%s3066_s3 + $0xb0] sm:$0xff] %v1189_v4  ;;  %v1125_v37 = vadd.f32 %v1017_v7, %v957_v55  ;;  %v1126_v49 = vadd.f32 %v1017_v7, %v958_v50  ;;  %v1346_v50 = vld [vmem:[%s3063_s0 + $0x98] sm:$0xff] }
 0x1a0   :  { %v1037_v5 = vpop.permute.xlu0 %1036  ;;  %1238 = vst.msk [vmem:[%s3066_s3 + $0xb8] sm:$0xff] %vm62_vm0, %v1190_v56  ;;  %v970_v4 = vmul.f32 %v1346_v50, %v2681_v33 }
 0x1a1   :  { %v1133_v32 = vadd.f32 %v1037_v5, %v965_v44  ;;  %v1134_v9 = vadd.f32 %v1037_v5, %v966_v14  ;;  %v1173_v0 = vmax.f32 %v1125_v37, 0.0  ;;  %v1174_v24 = vmax.f32 %v1126_v49, 0.0  ;;  %v1347_v44 = vld [vmem:[%s3063_s0 + $0xd0] sm:$0xff]  ;;  %v1348_v14 = vld [vmem:[%s3063_s0 + $0xd8] sm:$0xff] }
 0x1a2   :  { %v1072_v60 = vpop.permute.xlu2 %1071  ;;  %v977_v40 = vmul.f32 %v1347_v44, %v2683_v6  ;;  %v978_v7 = vmul.f32 %v1348_v14, %v2683_v6 }
 0x1a3   :  { %v1181_v1 = vmax.f32 %v1133_v32, 0.0  ;;  %v1182_v63 = vmax.f32 %v1134_v9, 0.0  ;;  %1221 = vst [vmem:[%s3066_s3 + $0x30] sm:$0xff] %v1173_v0  ;;  %v1147_v13 = vadd.f32 %v1072_v60, %v979_v21  ;;  %v1148_v53 = vadd.f32 %v1072_v60, %v980_v35  ;;  %v1349_v9 = vld [vmem:[%s3063_s0 + $0x140] sm:$0xff]  ;;  %v1350_v21 = vld [vmem:[%s3063_s0 + $0x148] sm:$0xff] }
 0x1a4   :  { %1222 = vst.msk [vmem:[%s3066_s3 + $0x38] sm:$0xff] %vm62_vm0, %v1174_v24  ;;  %v991_v22 = vmul.f32 %v1349_v9, %v2685_v59  ;;  %v992_v11 = vmul.f32 %v1350_v21, %v2685_v59  ;;  %v1351_v59 = vld [vmem:[%s3063_s0 + $0xc0] sm:$0xff] }
 0x1a5   :  { %v1195_v27 = vmax.f32 %v1147_v13, 0.0  ;;  %v1196_v23 = vmax.f32 %v1148_v53, 0.0  ;;  %1229 = vst [vmem:[%s3066_s3 + $0x70] sm:$0xff] %v1181_v1  ;;  %v975_v53 = vmul.f32 %v1351_v59, %v2687_v46 }
 0x1a6   :  { %v1032_v43 = vpop.permute.xlu1 %1031  ;;  %1230 = vst.msk [vmem:[%s3066_s3 + $0x78] sm:$0xff] %vm62_vm0, %v1182_v63 }
 0x1a7   :  { %1243 = vst [vmem:[%s3066_s3 + $0xe0] sm:$0xff] %v1195_v27  ;;  %v1131_v12 = vadd.f32 %v1032_v43, %v963_v31  ;;  %v1132_v28 = vadd.f32 %v1032_v43, %v964_v30  ;;  %v976_v31 = vmul.f32 %v1352_v26, %v2687_v46  ;;  %v1353_v27 = vld [vmem:[%s3063_s0 + $0x100] sm:$0xff] }
 0x1a8   :  { %v1052_v20 = vpop.permute.xlu0 %1051  ;;  %1244 = vst.msk [vmem:[%s3066_s3 + $0xe8] sm:$0xff] %vm62_vm0, %v1196_v23  ;;  %v983_v23 = vmul.f32 %v1353_v27, %v2689_v41 }
 0x1a9   :  { %v1139_v61 = vadd.f32 %v1052_v20, %v971_v42  ;;  %v1140_v48 = vadd.f32 %v1052_v20, %v972_v15  ;;  %v1179_v10 = vmax.f32 %v1131_v12, 0.0  ;;  %v1180_v8 = vmax.f32 %v1132_v28, 0.0  ;;  %v1355_v28 = vld [vmem:[%s3063_s0 + $0x170] sm:$0xff] }
 0x1aa   :  { %v1087_v29 = vpop.permute.xlu2 %1086  ;;  %v984_v42 = vmul.f32 %v1354_v45, %v2689_v41  ;;  %v997_v20 = vmul.f32 %v1355_v28, %v2691_v34 }
 0x1ab   :  { %v1187_v47 = vmax.f32 %v1139_v61, 0.0  ;;  %v1188_v57 = vmax.f32 %v1140_v48, 0.0  ;;  %1227 = vst [vmem:[%s3066_s3 + $0x60] sm:$0xff] %v1179_v10  ;;  %v1153_v62 = vadd.f32 %v1087_v29, %v985_v38  ;;  %v1154_v55 = vadd.f32 %v1087_v29, %v986_v3  ;;  %v1356_v61 = vld [vmem:[%s3063_s0 + $0x178] sm:$0xff] }
 0x1ac   :  { %1228 = vst.msk [vmem:[%s3066_s3 + $0x68] sm:$0xff] %vm62_vm0, %v1180_v8  ;;  %v998_v48 = vmul.f32 %v1356_v61, %v2691_v34  ;;  %v1357_v34 = vld [vmem:[%s3063_s0 + $0xf0] sm:$0xff] }
 0x1ad   :  { %v1201_v56 = vmax.f32 %v1153_v62, 0.0  ;;  %v1202_v16 = vmax.f32 %v1154_v55, 0.0  ;;  %1235 = vst [vmem:[%s3066_s3 + $0xa0] sm:$0xff] %v1187_v47  ;;  %v981_v47 = vmul.f32 %v1357_v34, %v2693_v36 }
 0x1ae   :  { %v1047_v37 = vpop.permute.xlu1 %1046  ;;  %1236 = vst.msk [vmem:[%s3066_s3 + $0xa8] sm:$0xff] %vm62_vm0, %v1188_v57  ;;  %v1358_v57 = vld [vmem:[%s3063_s0 + $0xf8] sm:$0xff] }
 0x1af   :  { %1249 = vst [vmem:[%s3066_s3 + $0x110] sm:$0xff] %v1201_v56  ;;  %v1137_v33 = vadd.f32 %v1047_v37, %v969_v52  ;;  %v1138_v49 = vadd.f32 %v1047_v37, %v970_v4  ;;  %v982_v62 = vmul.f32 %v1358_v57, %v2693_v36  ;;  %v1359_v52 = vld [vmem:[%s3063_s0 + $0x130] sm:$0xff]  ;;  %v1360_v4 = vld [vmem:[%s3063_s0 + $0x138] sm:$0xff] }
 0x1b0   :  { %v1067_v5 = vpop.permute.xlu0 %1066  ;;  %1250 = vst.msk [vmem:[%s3066_s3 + $0x118] sm:$0xff] %vm62_vm0, %v1202_v16  ;;  %v989_v50 = vmul.f32 %v1359_v52, %v2695_v18  ;;  %v990_v56 = vmul.f32 %v1360_v4, %v2695_v18 }
 0x1b1   :  { %v1145_v32 = vadd.f32 %v1067_v5, %v977_v40  ;;  %v1146_v6 = vadd.f32 %v1067_v5, %v978_v7  ;;  %v1185_v35 = vmax.f32 %v1137_v33, 0.0  ;;  %v1186_v0 = vmax.f32 %v1138_v49, 0.0  ;;  %v1361_v5 = vld [vmem:[%s3063_s0 + $0x120] sm:$0xff] }
 0x1b2   :  { %v1102_v24 = vpop.permute.xlu2 %1101 }
 0x1b3   :  { %v1193_v60 = vmax.f32 %v1145_v32, 0.0  ;;  %v1194_v1 = vmax.f32 %v1146_v6, 0.0  ;;  %1233 = vst [vmem:[%s3066_s3 + $0x90] sm:$0xff] %v1185_v35  ;;  %v1159_v63 = vadd.f32 %v1102_v24, %v991_v22  ;;  %v1160_v13 = vadd.f32 %v1102_v24, %v992_v11  ;;  %v1362_v6 = vld [vmem:[%s3063_s0 + $0x128] sm:$0xff]  ;;  %v1363_v22 = vld [vmem:[%s3063_s0 + $0x160] sm:$0xff] }
 0x1b4   :  { %1234 = vst.msk [vmem:[%s3066_s3 + $0x98] sm:$0xff] %vm62_vm0, %v1186_v0  ;;  %v987_v32 = vmul.f32 %v1361_v5, %v2705_v58  ;;  %v988_v9 = vmul.f32 %v1362_v6, %v2705_v58  ;;  %v995_v21 = vmul.f32 %v1363_v22, %v2710_v25  ;;  %v1364_v11 = vld [vmem:[%s3063_s0 + $0x168] sm:$0xff] }
 0x1b5   :  { %v1207_v17 = vmax.f32 %v1159_v63, 0.0  ;;  %v1208_v30 = vmax.f32 %v1160_v13, 0.0  ;;  %1241 = vst [vmem:[%s3066_s3 + $0xd0] sm:$0xff] %v1193_v60  ;;  %v996_v35 = vmul.f32 %v1364_v11, %v2710_v25  ;;  %v1365_v25 = vld [vmem:[%s3063_s0 + $0x150] sm:$0xff] }
 0x1b6   :  { %v1062_v39 = vpop.permute.xlu1 %1061  ;;  %1242 = vst.msk [vmem:[%s3066_s3 + $0xd8] sm:$0xff] %vm62_vm0, %v1194_v1 }
 0x1b7   :  { %1255 = vst [vmem:[%s3066_s3 + $0x140] sm:$0xff] %v1207_v17  ;;  %v1143_v46 = vadd.f32 %v1062_v39, %v975_v53  ;;  %v1144_v15 = vadd.f32 %v1062_v39, %v976_v31  ;;  %v993_v31 = vmul.f32 %v1365_v25, %v2732_v51  ;;  %v1366_v17 = vld [vmem:[%s3063_s0 + $0x158] sm:$0xff] }
 0x1b8   :  { %v1082_v43 = vpop.permute.xlu0 %1081  ;;  %1256 = vst.msk [vmem:[%s3066_s3 + $0x148] sm:$0xff] %vm62_vm0, %v1208_v30  ;;  %v994_v30 = vmul.f32 %v1366_v17, %v2732_v51 }
 0x1b9   :  { %v1151_v12 = vadd.f32 %v1082_v43, %v983_v23  ;;  %v1152_v41 = vadd.f32 %v1082_v43, %v984_v42  ;;  %v1191_v2 = vmax.f32 %v1143_v46, 0.0  ;;  %v1192_v38 = vmax.f32 %v1144_v15, 0.0 }
 0x1ba   :  { %v1117_v19 = vpop.permute.xlu2 %1116 }
 0x1bb   :  { %v1199_v3 = vmax.f32 %v1151_v12, 0.0  ;;  %v1200_v10 = vmax.f32 %v1152_v41, 0.0  ;;  %1239 = vst [vmem:[%s3066_s3 + $0xc0] sm:$0xff] %v1191_v2  ;;  %v1165_v8 = vadd.f32 %v1117_v19, %v997_v20  ;;  %v1166_v29 = vadd.f32 %v1117_v19, %v998_v48 }
 0x1bc   :  { %1240 = vst.msk [vmem:[%s3066_s3 + $0xc8] sm:$0xff] %vm62_vm0, %v1192_v38 }
 0x1bd   :  { %v1213_v55 = vmax.f32 %v1165_v8, 0.0  ;;  %v1214_v54 = vmax.f32 %v1166_v29, 0.0  ;;  %1247 = vst [vmem:[%s3066_s3 + $0x100] sm:$0xff] %v1199_v3 }
 0x1be   :  { %v1077_v16 = vpop.permute.xlu1 %1076  ;;  %1248 = vst.msk [vmem:[%s3066_s3 + $0x108] sm:$0xff] %vm62_vm0, %v1200_v10 }
 0x1bf   :  { %1261 = vst [vmem:[%s3066_s3 + $0x170] sm:$0xff] %v1213_v55  ;;  %v1149_v36 = vadd.f32 %v1077_v16, %v981_v47  ;;  %v1150_v44 = vadd.f32 %v1077_v16, %v982_v62 }
 0x1c0   :  { %v1097_v40 = vpop.permute.xlu0 %1096  ;;  %1262 = vst.msk [vmem:[%s3066_s3 + $0x178] sm:$0xff] %vm62_vm0, %v1214_v54 }
 0x1c1   :  { %v1157_v14 = vadd.f32 %v1097_v40, %v989_v50  ;;  %v1158_v18 = vadd.f32 %v1097_v40, %v990_v56  ;;  %v1197_v7 = vmax.f32 %v1149_v36, 0.0  ;;  %v1198_v37 = vmax.f32 %v1150_v44, 0.0 }
 0x1c3   :  { %v1205_v33 = vmax.f32 %v1157_v14, 0.0  ;;  %v1206_v49 = vmax.f32 %v1158_v18, 0.0  ;;  %1245 = vst [vmem:[%s3066_s3 + $0xf0] sm:$0xff] %v1197_v7 }
 0x1c4   :  { %1246 = vst.msk [vmem:[%s3066_s3 + $0xf8] sm:$0xff] %vm62_vm0, %v1198_v37 }
 0x1c5   :  { %1253 = vst [vmem:[%s3066_s3 + $0x130] sm:$0xff] %v1205_v33 }
 0x1c6   :  { %v1092_v0 = vpop.permute.xlu1 %1091  ;;  %1254 = vst.msk [vmem:[%s3066_s3 + $0x138] sm:$0xff] %vm62_vm0, %v1206_v49 }
 0x1c7   :  { %v1155_v58 = vadd.f32 %v1092_v0, %v987_v32  ;;  %v1156_v24 = vadd.f32 %v1092_v0, %v988_v9 }
 0x1c8   :  { %v1112_v60 = vpop.permute.xlu0 %1111 }
 0x1c9   :  { %v1163_v1 = vadd.f32 %v1112_v60, %v995_v21  ;;  %v1164_v63 = vadd.f32 %v1112_v60, %v996_v35  ;;  %v1203_v13 = vmax.f32 %v1155_v58, 0.0  ;;  %v1204_v59 = vmax.f32 %v1156_v24, 0.0 }
 0x1cb   :  { %v1211_v53 = vmax.f32 %v1163_v1, 0.0  ;;  %v1212_v26 = vmax.f32 %v1164_v63, 0.0  ;;  %1251 = vst [vmem:[%s3066_s3 + $0x120] sm:$0xff] %v1203_v13 }
 0x1cc   :  { %1252 = vst.msk [vmem:[%s3066_s3 + $0x128] sm:$0xff] %vm62_vm0, %v1204_v59 }
 0x1cd   :  { %1259 = vst [vmem:[%s3066_s3 + $0x160] sm:$0xff] %v1211_v53 }
 0x1ce   :  { %v1107_v27 = vpop.permute.xlu1 %1106  ;;  %1260 = vst.msk [vmem:[%s3066_s3 + $0x168] sm:$0xff] %vm62_vm0, %v1212_v26 }
 0x1cf   :  { %v1161_v23 = vadd.f32 %v1107_v27, %v993_v31  ;;  %v1162_v45 = vadd.f32 %v1107_v27, %v994_v30 }
 0x1d1   :  { %v1209_v42 = vmax.f32 %v1161_v23, 0.0  ;;  %v1210_v39 = vmax.f32 %v1162_v45, 0.0 }
 0x1d3   :  { %1257 = vst [vmem:[%s3066_s3 + $0x150] sm:$0xff] %v1209_v42 }
 0x1d4   :  { %1258 = vst.msk [vmem:[%s3066_s3 + $0x158] sm:$0xff] %vm62_vm0, %v1210_v39 }

</bundles_post_ra>
